<compile_context>
chip_gen: v5e
topology: v5e:2x2
jax: 0.10.0
libtpu: 0.0.40
codegen_flags: <defaults>
</compile_context>

<pallas_src>
import functools

import jax
import jax.numpy as jnp
from jax import lax
from jax.experimental import pallas as pl
from jax.experimental.pallas import tpu as pltpu


def _round_up(x, m):
    return (x + m - 1) // m * m


def _cparams():
    return pltpu.CompilerParams(
        dimension_semantics=("parallel",),
        vmem_limit_bytes=32 * 1024 * 1024,
    )


# ----------------------------------------------------------------------------
# Kernel 1: conv1 (7x7 / s2 / p3, no bias) as an im2col GEMM + folded BN + ReLU
# ----------------------------------------------------------------------------

def _conv1_gemm_kernel(x_ref, w_ref, s_ref, b_ref, o_ref):
    acc = jnp.dot(x_ref[...], w_ref[...], preferred_element_type=jnp.float32)
    acc = acc * s_ref[...] + b_ref[...]
    o_ref[...] = jnp.maximum(acc, 0.0).astype(o_ref.dtype)


def im2col(x, kh, kw, stride, pad):
    """x: [N, H, W, C] -> ([N*Ho*Wo, kh*kw*C], (N, Ho, Wo)) -- used only for the 7x7 stem."""
    n, h, w, c = x.shape
    xp = jnp.pad(x, ((0, 0), (pad, pad), (pad, pad), (0, 0)))
    hp, wp = h + 2 * pad, w + 2 * pad
    ho = (hp - kh) // stride + 1
    wo = (wp - kw) // stride + 1
    pats = [xp[:, i:i + stride * ho:stride, j:j + stride * wo:stride, :]
            for i in range(kh) for j in range(kw)]
    cols = jnp.stack(pats, axis=3)                      # [N, Ho, Wo, kh*kw, C]
    return cols.reshape(n * ho * wo, kh * kw * c), (n, ho, wo)


def conv_weight_to_matrix(w):
    """PyTorch conv weight [Cout, Cin, kh, kw] -> [kh*kw*Cin, Cout] (matches im2col order)."""
    cout, cin, kh, kw = w.shape
    return jnp.transpose(w, (2, 3, 1, 0)).reshape(kh * kw * cin, cout)


def conv1_bn_relu(x, w, scale, bias, *, tile_m=512):
    """7x7 / stride-2 / pad-3 conv (no bias) + folded BN + ReLU (im2col + tiled GEMM kernel)."""
    cols, (n, ho, wo) = im2col(x, 7, 7, 2, 3)                # bf16 (input already bf16)
    m, k = cols.shape
    k_pad = _round_up(k, 128)                                # 147 -> 256, lane aligned
    cols = jnp.pad(cols, ((0, 0), (0, k_pad - k)))
    wm = jnp.pad(conv_weight_to_matrix(w), ((0, k_pad - k), (0, 0))).astype(jnp.bfloat16)
    n_out = wm.shape[1]

    m8 = _round_up(m, 8)
    tm = min(tile_m, m8)
    if m8 // tm < 2 and m8 >= 16:      # keep the grid >= 2 so both v7x TensorCores get work
        tm = _round_up(pl.cdiv(m8, 2), 8)
    m_pad = _round_up(m, tm)
    if m_pad != m:
        cols = jnp.pad(cols, ((0, m_pad - m), (0, 0)))

    out = pl.pallas_call(
        _conv1_gemm_kernel,
        out_shape=jax.ShapeDtypeStruct((m_pad, n_out), jnp.bfloat16),
        grid=(m_pad // tm,),
        in_specs=[
            pl.BlockSpec((tm, k_pad), lambda i: (i, 0)),
            pl.BlockSpec((k_pad, n_out), lambda i: (0, 0)),
            pl.BlockSpec((1, n_out), lambda i: (0, 0)),
            pl.BlockSpec((1, n_out), lambda i: (0, 0)),
        ],
        out_specs=pl.BlockSpec((tm, n_out), lambda i: (i, 0)),
        compiler_params=_cparams(),
    )(cols, wm,
      scale.reshape(1, n_out).astype(jnp.float32),
      bias.reshape(1, n_out).astype(jnp.float32))
    out = out[:m] if m_pad != m else out
    return out.reshape(n, ho, wo, n_out)


# ----------------------------------------------------------------------------
# Kernel 2: fused tail -- maxpool(3,2,1) + conv3x3+BN+ReLU + conv3x3+BN + avgpool + fc
# ----------------------------------------------------------------------------

def _fused_tail_kernel(planes_ref, w1_ref, s1_ref, b1_ref, w2_ref, s2_ref, b2_ref,
                       fcw_ref, fcb_ref, o_ref, *, h, w, rw, c):
    ext = h * rw               # extended rows: row oy*rw+ox, valid columns ox < w per group

    # ---- max_pool2d(k=3, s=2, p=1): 9-tap running max over parity-split planes (VPU) ----
    ee = planes_ref[0, 0].astype(jnp.float32)
    eo = planes_ref[0, 1].astype(jnp.float32)
    oe = planes_ref[0, 2].astype(jnp.float32)
    oo = planes_ref[0, 3].astype(jnp.float32)
    m = ee[0:ext]
    m = jnp.maximum(m, ee[1:ext + 1])
    m = jnp.maximum(m, ee[rw:ext + rw])
    m = jnp.maximum(m, ee[rw + 1:ext + rw + 1])
    m = jnp.maximum(m, eo[0:ext])
    m = jnp.maximum(m, eo[rw:ext + rw])
    m = jnp.maximum(m, oe[0:ext])
    m = jnp.maximum(m, oe[1:ext + 1])
    m = jnp.maximum(m, oo[0:ext])                   # (ext, c) f32, junk at cols >= w per group

    # junk columns (w .. rw-1 of each rw-row group) must be zeroed before feeding a conv / pool
    col_ok = (lax.broadcasted_iota(jnp.int32, (ext, c), 0) % rw) < w

    # zero-embedded flattened activation: pf[g + base] == padded activation at flat index g
    pre = _round_up(rw + 1, 8)
    base = pre - (rw + 1)
    total = _round_up(pre + ext + rw + 1, 8)
    zpre = jnp.zeros((pre, c), jnp.float32)
    zpost = jnp.zeros((total - pre - ext, c), jnp.float32)

    def conv3x3_bn(x_ext, w_ref, s_ref, b_ref, relu):
        # 3x3 / s1 / p1 conv: 9 shifted row views feed a single f32 accumulation expression
        # on the MXU (bf16 operands), then folded-BN scale/bias (+ReLU) in f32.
        xm = jnp.where(col_ok, x_ext, jnp.zeros_like(x_ext))
        pf = jnp.concatenate([zpre, xm, zpost], axis=0)          # (total, c) f32
        acc = None
        for di in range(3):
            for dj in range(3):
                off = base + di * rw + dj
                tap = jnp.dot(pf[off:off + ext].astype(jnp.bfloat16),
                              w_ref[di * 3 + dj],
                              preferred_element_type=jnp.float32)
                acc = tap if acc is None else acc + tap
        acc = acc * s_ref[...] + b_ref[...]
        if relu:
            acc = jnp.maximum(acc, 0.0)
        return acc                                               # (ext, c) f32

    y1 = conv3x3_bn(m, w1_ref, s1_ref, b1_ref, relu=True)
    y2 = conv3x3_bn(y1, w2_ref, s2_ref, b2_ref, relu=False)

    # ---- AdaptiveAvgPool2d((1,1)) + Linear(64, 1000->1024); pooled & fc kept in f32 ----
    y2m = jnp.where(col_ok, y2, jnp.zeros_like(y2))
    pooled = jnp.sum(y2m, axis=0, keepdims=True) * (1.0 / (h * w))       # (1, c) f32
    o_ref[0] = jnp.dot(pooled, fcw_ref[...], preferred_element_type=jnp.float32) + fcb_ref[...]


def conv3x3_weight_taps(w):
    """PyTorch conv weight [Cout, Cin, 3, 3] -> [9, Cin, Cout] (tap index = di*3 + dj), bf16."""
    cout, cin, kh, kw = w.shape
    return jnp.transpose(w, (2, 3, 1, 0)).reshape(kh * kw, cin, cout).astype(jnp.bfloat16)


def bn_fold(bn, eps=1e-5):
    """Eval-mode BatchNorm -> per-channel (scale, bias)."""
    scale = bn["gamma"] / jnp.sqrt(bn["running_var"] + eps)
    bias = bn["beta"] - bn["running_mean"] * scale
    return scale, bias


def make_pool_planes(y, rw):
    """Parity-split, zero-pad and row-flatten the post-ReLU conv1 output (NHWC) so the fused
    tail kernel only needs unit-stride 2-D row slices.  y: (N, H, W, C) with H, W even."""
    n, hh, ww, c = y.shape
    assert hh % 2 == 0 and ww % 2 == 0, "fused maxpool path assumes even spatial dims"
    ph, pw = hh // 2, ww // 2
    yp = jnp.pad(y, ((0, 0), (1, 1), (1, 1), (0, 0)))           # zero pad is exact (post-ReLU)
    planes = jnp.stack([yp[:, 0::2, 0::2, :], yp[:, 0::2, 1::2, :],
                        yp[:, 1::2, 0::2, :], yp[:, 1::2, 1::2, :]], axis=1)
    # pad plane width (pw+1) -> rw and rows (ph+1) -> ph+2, then flatten rows
    planes = jnp.pad(planes, ((0, 0), (0, 0), (0, 1), (0, rw - (pw + 1)), (0, 0)))
    return planes.reshape(n, 4, (ph + 2) * rw, c), (ph, pw)


def fused_tail(planes, w1_taps, s1, b1, w2_taps, s2, b2, fc_w, fc_b, *, h, w, rw):
    n, _, plane_len, c = planes.shape
    n_out = fc_w.shape[0]
    n_pad = _round_up(n_out, 128)                                # 1000 -> 1024 lane-dense store
    fcw = jnp.pad(fc_w.T, ((0, 0), (0, n_pad - n_out))).astype(jnp.float32)
    fcb = jnp.pad(fc_b, (0, n_pad - n_out)).reshape(1, n_pad).astype(jnp.float32)
    vec = lambda v: v.reshape(1, c).astype(jnp.float32)
    kernel = functools.partial(_fused_tail_kernel, h=h, w=w, rw=rw, c=c)
    out = pl.pallas_call(
        kernel,
        out_shape=jax.ShapeDtypeStruct((n, 1, n_pad), jnp.float32),
        grid=(n,),
        in_specs=[
            pl.BlockSpec((1, 4, plane_len, c), lambda i: (i, 0, 0, 0)),
            pl.BlockSpec((9, c, c), lambda i: (0, 0, 0)),
            pl.BlockSpec((1, c), lambda i: (0, 0)),
            pl.BlockSpec((1, c), lambda i: (0, 0)),
            pl.BlockSpec((9, c, c), lambda i: (0, 0, 0)),
            pl.BlockSpec((1, c), lambda i: (0, 0)),
            pl.BlockSpec((1, c), lambda i: (0, 0)),
            pl.BlockSpec((c, n_pad), lambda i: (0, 0)),
            pl.BlockSpec((1, n_pad), lambda i: (0, 0)),
        ],
        out_specs=pl.BlockSpec((1, 1, n_pad), lambda i: (i, 0, 0)),
        compiler_params=_cparams(),
    )(planes, w1_taps, vec(s1), vec(b1), w2_taps, vec(s2), vec(b2), fcw, fcb)
    return out.reshape(n, n_pad)[:, :n_out]


# ----------------------------------------------------------------------------
# Forward pass (matches Net_single_layer.forward)
# ----------------------------------------------------------------------------

def net_single_layer_forward(x_nchw, params):
    x = jnp.transpose(x_nchw, (0, 2, 3, 1)).astype(jnp.bfloat16)   # NCHW -> NHWC, bf16

    # conv1 (7x7, s2, p3, no bias) + bn1 + relu
    s1, b1 = bn_fold(params["bn1"])
    y = conv1_bn_relu(x, params["conv1_w"], s1, b1)                # (N, 8, 8, 64) bf16

    # fused tail: max_pool2d(3,2,1) + layer1 (conv/bn/relu/conv/bn) + avgpool + fc
    pw = y.shape[2] // 2
    rw = _round_up(pw + 2, 8)                                      # sublane-aligned row pitch
    planes, (ph, pw) = make_pool_planes(y, rw)                     # (N, 4, 48, 64) bf16

    sa, ba = bn_fold(params["l1_bn1"])
    sb, bb = bn_fold(params["l1_bn2"])
    return fused_tail(planes,
                      conv3x3_weight_taps(params["l1_conv1_w"]), sa, ba,
                      conv3x3_weight_taps(params["l1_conv2_w"]), sb, bb,
                      params["fc_w"], params["fc_b"],
                      h=ph, w=pw, rw=rw)                           # (N, 1000) f32


# ----------------------------------------------------------------------------
# Plain-JAX f32 reference (for a correctness sanity check)
# ----------------------------------------------------------------------------

def _reference_forward(x_nchw, params):
    x = jnp.transpose(x_nchw, (0, 2, 3, 1)).astype(jnp.float32)

    def conv(v, wt, stride, pad):
        return lax.conv_general_dilated(
            v, jnp.transpose(wt, (2, 3, 1, 0)).astype(jnp.float32),
            (stride, stride), ((pad, pad), (pad, pad)),
            dimension_numbers=("NHWC", "HWIO", "NHWC"))

    def bn(v, p):
        s, b = bn_fold(p)
        return v * s + b

    y = jnp.maximum(bn(conv(x, params["conv1_w"], 2, 3), params["bn1"]), 0.0)
    y = lax.reduce_window(y, -jnp.inf, lax.max, (1, 3, 3, 1), (1, 2, 2, 1),
                          ((0, 0), (1, 1), (1, 1), (0, 0)))
    y = jnp.maximum(bn(conv(y, params["l1_conv1_w"], 1, 1), params["l1_bn1"]), 0.0)
    y = bn(conv(y, params["l1_conv2_w"], 1, 1), params["l1_bn2"])
    pooled = jnp.mean(y, axis=(1, 2))
    return pooled @ params["fc_w"].T + params["fc_b"]


# ----------------------------------------------------------------------------
# Deterministic parameter initialization (shapes from Net_single_layer.__init__)
# ----------------------------------------------------------------------------

def init_params(key):
    ks = jax.random.split(key, 8)

    def bn_params(k, c):
        k1, k2, k3, k4 = jax.random.split(k, 4)
        return {
            "gamma": 0.5 + jax.random.uniform(k1, (c,), jnp.float32),
            "beta": 0.1 * jax.random.normal(k2, (c,), jnp.float32),
            "running_mean": 0.1 * jax.random.normal(k3, (c,), jnp.float32),
            "running_var": 0.5 + jax.random.uniform(k4, (c,), jnp.float32),
        }

    return {
        "conv1_w": 0.05 * jax.random.normal(ks[0], (64, 3, 7, 7), jnp.float32),
        "bn1": bn_params(ks[1], 64),
        "l1_conv1_w": 0.05 * jax.random.normal(ks[2], (64, 64, 3, 3), jnp.float32),
        "l1_bn1": bn_params(ks[3], 64),
        "l1_conv2_w": 0.05 * jax.random.normal(ks[4], (64, 64, 3, 3), jnp.float32),
        "l1_bn2": bn_params(ks[5], 64),
        "fc_w": 0.05 * jax.random.normal(ks[6], (1000, 64), jnp.float32),
        "fc_b": 0.01 * jax.random.normal(ks[7], (1000,), jnp.float32),
    }


if __name__ == "__main__":
    key = jax.random.PRNGKey(0)
    kx, kp = jax.random.split(key)
    x = jax.random.normal(kx, (2, 3, 16, 16), jnp.float32)  # NCHW, like PyTorch
    params = init_params(kp)

    fwd = jax.jit(net_single_layer_forward)
    out = jax.block_until_ready(fwd(x, params))
    assert out.shape == (2, 1000), out.shape
    assert bool(jnp.all(jnp.isfinite(out)))

    # sanity check vs. an f32 XLA reference (kernel uses bf16 intermediates -> loose tolerance)
    ref = _reference_forward(x, params)
    rel = float(jnp.linalg.norm(out - ref) / (jnp.linalg.norm(ref) + 1e-12))
    assert rel < 4e-2, f"relative error vs reference too large: {rel}"

    print("KERNEL_OK")
</pallas_src>

<mosaic_0001>
module attributes {stable_mosaic.version = 11 : i64} {
  func.func @_conv1_gemm_kernel(%arg0: i32, %arg1: memref<64x256xbf16, #tpu.memory_space<vmem>>, %arg2: memref<256x64xbf16, #tpu.memory_space<vmem>>, %arg3: memref<1x64xf32, #tpu.memory_space<vmem>>, %arg4: memref<1x64xf32, #tpu.memory_space<vmem>>, %arg5: memref<64x64xbf16, #tpu.memory_space<vmem>>) attributes {dimension_semantics = [#tpu.dimension_semantics<parallel>], iteration_bounds = array<i64: 2>, scalar_prefetch = 0 : i64, scratch_operands = 0 : i64, tpu.core_type = #tpu.core_type<tc>, window_params = [{transform_indices = @transform_0, window_bounds = array<i64: 64, 256>}, {pipeline_mode = #tpu.pipeline_mode<synchronous>, transform_indices = @transform_1, window_bounds = array<i64: 256, 64>}, {pipeline_mode = #tpu.pipeline_mode<synchronous>, transform_indices = @transform_2, window_bounds = array<i64: 1, 64>}, {pipeline_mode = #tpu.pipeline_mode<synchronous>, transform_indices = @transform_3, window_bounds = array<i64: 1, 64>}, {transform_indices = @transform_4, window_bounds = array<i64: 64, 64>}]} {
    %c0 = arith.constant 0 : index
    %c0_0 = arith.constant 0 : index
    %0 = vector.load %arg1[%c0, %c0_0] : memref<64x256xbf16, #tpu.memory_space<vmem>>, vector<64x256xbf16>
    %c0_1 = arith.constant 0 : index
    %c0_2 = arith.constant 0 : index
    %1 = vector.load %arg2[%c0_1, %c0_2] : memref<256x64xbf16, #tpu.memory_space<vmem>>, vector<256x64xbf16>
    %cst = arith.constant dense<0.000000e+00> : vector<64x64xf32>
    %2 = tpu.matmul %0, %1, %cst {dimension_numbers = #tpu.dot_dimension_numbers<[1], [0], [0], [1], [0, 0, 1, 1], [], []>} : vector<64x256xbf16>, vector<256x64xbf16>, vector<64x64xf32> -> vector<64x64xf32>
    %c0_3 = arith.constant 0 : index
    %c0_4 = arith.constant 0 : index
    %3 = vector.load %arg3[%c0_3, %c0_4] : memref<1x64xf32, #tpu.memory_space<vmem>>, vector<1x64xf32>
    %4 = vector.broadcast %3 : vector<1x64xf32> to vector<64x64xf32>
    %5 = arith.mulf %2, %4 : vector<64x64xf32>
    %c0_5 = arith.constant 0 : index
    %c0_6 = arith.constant 0 : index
    %6 = vector.load %arg4[%c0_5, %c0_6] : memref<1x64xf32, #tpu.memory_space<vmem>>, vector<1x64xf32>
    %7 = vector.broadcast %6 : vector<1x64xf32> to vector<64x64xf32>
    %8 = arith.addf %5, %7 : vector<64x64xf32>
    %cst_7 = arith.constant 0.000000e+00 : f32
    %9 = vector.broadcast %cst_7 : f32 to vector<64x64xf32>
    %10 = arith.maximumf %8, %9 : vector<64x64xf32>
    %11 = arith.truncf %10 : vector<64x64xf32> to vector<64x64xbf16>
    %c0_8 = arith.constant 0 : index
    %c0_9 = arith.constant 0 : index
    %12 = vector.load %arg5[%c0_8, %c0_9] : memref<64x64xbf16, #tpu.memory_space<vmem>>, vector<64x64xbf16>
    tpu.vector_store %arg5[%c0_8, %c0_9], %11 {strides = array<i32>} : memref<64x64xbf16, #tpu.memory_space<vmem>>, vector<64x64xbf16>,
    return
  }
  func.func @transform_0(%arg0: i32) -> (i32, i32) {
    %c0_i32 = arith.constant 0 : i32
    %c0_i32_0 = arith.constant 0 : i32
    return %arg0, %c0_i32 : i32, i32
  }
  func.func @transform_1(%arg0: i32) -> (i32, i32) {
    %c0_i32 = arith.constant 0 : i32
    %c0_i32_0 = arith.constant 0 : i32
    %c0_i32_1 = arith.constant 0 : i32
    return %c0_i32, %c0_i32_0 : i32, i32
  }
  func.func @transform_2(%arg0: i32) -> (i32, i32) {
    %c0_i32 = arith.constant 0 : i32
    %c0_i32_0 = arith.constant 0 : i32
    %c0_i32_1 = arith.constant 0 : i32
    return %c0_i32, %c0_i32_0 : i32, i32
  }
  func.func @transform_3(%arg0: i32) -> (i32, i32) {
    %c0_i32 = arith.constant 0 : i32
    %c0_i32_0 = arith.constant 0 : i32
    %c0_i32_1 = arith.constant 0 : i32
    return %c0_i32, %c0_i32_0 : i32, i32
  }
  func.func @transform_4(%arg0: i32) -> (i32, i32) {
    %c0_i32 = arith.constant 0 : i32
    %c0_i32_0 = arith.constant 0 : i32
    return %arg0, %c0_i32 : i32, i32
  }
}

module attributes {stable_mosaic.version = 11 : i64} {
  func.func @_fused_tail_kernel(%arg0: i32, %arg1: memref<1x4x48x64xbf16, #tpu.memory_space<vmem>>, %arg2: memref<9x64x64xbf16, #tpu.memory_space<vmem>>, %arg3: memref<1x64xf32, #tpu.memory_space<vmem>>, %arg4: memref<1x64xf32, #tpu.memory_space<vmem>>, %arg5: memref<9x64x64xbf16, #tpu.memory_space<vmem>>, %arg6: memref<1x64xf32, #tpu.memory_space<vmem>>, %arg7: memref<1x64xf32, #tpu.memory_space<vmem>>, %arg8: memref<64x1024xf32, #tpu.memory_space<vmem>>, %arg9: memref<1x1024xf32, #tpu.memory_space<vmem>>, %arg10: memref<1x1x1024xf32, #tpu.memory_space<vmem>>) attributes {dimension_semantics = [#tpu.dimension_semantics<parallel>], iteration_bounds = array<i64: 2>, scalar_prefetch = 0 : i64, scratch_operands = 0 : i64, tpu.core_type = #tpu.core_type<tc>, window_params = [{transform_indices = @transform_0, window_bounds = array<i64: 1, 4, 48, 64>}, {pipeline_mode = #tpu.pipeline_mode<synchronous>, transform_indices = @transform_1, window_bounds = array<i64: 9, 64, 64>}, {pipeline_mode = #tpu.pipeline_mode<synchronous>, transform_indices = @transform_2, window_bounds = array<i64: 1, 64>}, {pipeline_mode = #tpu.pipeline_mode<synchronous>, transform_indices = @transform_3, window_bounds = array<i64: 1, 64>}, {pipeline_mode = #tpu.pipeline_mode<synchronous>, transform_indices = @transform_4, window_bounds = array<i64: 9, 64, 64>}, {pipeline_mode = #tpu.pipeline_mode<synchronous>, transform_indices = @transform_5, window_bounds = array<i64: 1, 64>}, {pipeline_mode = #tpu.pipeline_mode<synchronous>, transform_indices = @transform_6, window_bounds = array<i64: 1, 64>}, {pipeline_mode = #tpu.pipeline_mode<synchronous>, transform_indices = @transform_7, window_bounds = array<i64: 64, 1024>}, {pipeline_mode = #tpu.pipeline_mode<synchronous>, transform_indices = @transform_8, window_bounds = array<i64: 1, 1024>}, {transform_indices = @transform_9, window_bounds = array<i64: 1, 1, 1024>}]} {
    %c0 = arith.constant 0 : index
    %c0_0 = arith.constant 0 : index
    %c0_1 = arith.constant 0 : index
    %c0_2 = arith.constant 0 : index
    %0 = vector.load %arg1[%c0, %c0_0, %c0_1, %c0_2] : memref<1x4x48x64xbf16, #tpu.memory_space<vmem>>, vector<1x1x48x64xbf16>
    %1 = vector.shape_cast %0 : vector<1x1x48x64xbf16> to vector<48x64xbf16>
    %2 = arith.extf %1 : vector<48x64xbf16> to vector<48x64xf32>
    %c0_3 = arith.constant 0 : index
    %c1 = arith.constant 1 : index
    %c0_4 = arith.constant 0 : index
    %c0_5 = arith.constant 0 : index
    %3 = vector.load %arg1[%c0_3, %c1, %c0_4, %c0_5] : memref<1x4x48x64xbf16, #tpu.memory_space<vmem>>, vector<1x1x48x64xbf16>
    %4 = vector.shape_cast %3 : vector<1x1x48x64xbf16> to vector<48x64xbf16>
    %5 = arith.extf %4 : vector<48x64xbf16> to vector<48x64xf32>
    %c0_6 = arith.constant 0 : index
    %c2 = arith.constant 2 : index
    %c0_7 = arith.constant 0 : index
    %c0_8 = arith.constant 0 : index
    %6 = vector.load %arg1[%c0_6, %c2, %c0_7, %c0_8] : memref<1x4x48x64xbf16, #tpu.memory_space<vmem>>, vector<1x1x48x64xbf16>
    %7 = vector.shape_cast %6 : vector<1x1x48x64xbf16> to vector<48x64xbf16>
    %8 = arith.extf %7 : vector<48x64xbf16> to vector<48x64xf32>
    %c0_9 = arith.constant 0 : index
    %c3 = arith.constant 3 : index
    %c0_10 = arith.constant 0 : index
    %c0_11 = arith.constant 0 : index
    %9 = vector.load %arg1[%c0_9, %c3, %c0_10, %c0_11] : memref<1x4x48x64xbf16, #tpu.memory_space<vmem>>, vector<1x1x48x64xbf16>
    %10 = vector.shape_cast %9 : vector<1x1x48x64xbf16> to vector<48x64xbf16>
    %11 = arith.extf %10 : vector<48x64xbf16> to vector<48x64xf32>
    %12 = vector.extract_strided_slice %2 {offsets = [0, 0], sizes = [32, 64], strides = [1, 1]} : vector<48x64xf32> to vector<32x64xf32>
    %13 = vector.extract_strided_slice %2 {offsets = [1, 0], sizes = [32, 64], strides = [1, 1]} : vector<48x64xf32> to vector<32x64xf32>
    %14 = arith.maximumf %12, %13 : vector<32x64xf32>
    %15 = vector.extract_strided_slice %2 {offsets = [8, 0], sizes = [32, 64], strides = [1, 1]} : vector<48x64xf32> to vector<32x64xf32>
    %16 = arith.maximumf %14, %15 : vector<32x64xf32>
    %17 = vector.extract_strided_slice %2 {offsets = [9, 0], sizes = [32, 64], strides = [1, 1]} : vector<48x64xf32> to vector<32x64xf32>
    %18 = arith.maximumf %16, %17 : vector<32x64xf32>
    %19 = vector.extract_strided_slice %5 {offsets = [0, 0], sizes = [32, 64], strides = [1, 1]} : vector<48x64xf32> to vector<32x64xf32>
    %20 = arith.maximumf %18, %19 : vector<32x64xf32>
    %21 = vector.extract_strided_slice %5 {offsets = [8, 0], sizes = [32, 64], strides = [1, 1]} : vector<48x64xf32> to vector<32x64xf32>
    %22 = arith.maximumf %20, %21 : vector<32x64xf32>
    %23 = vector.extract_strided_slice %8 {offsets = [0, 0], sizes = [32, 64], strides = [1, 1]} : vector<48x64xf32> to vector<32x64xf32>
    %24 = arith.maximumf %22, %23 : vector<32x64xf32>
    %25 = vector.extract_strided_slice %8 {offsets = [1, 0], sizes = [32, 64], strides = [1, 1]} : vector<48x64xf32> to vector<32x64xf32>
    %26 = arith.maximumf %24, %25 : vector<32x64xf32>
    %27 = vector.extract_strided_slice %11 {offsets = [0, 0], sizes = [32, 64], strides = [1, 1]} : vector<48x64xf32> to vector<32x64xf32>
    %28 = arith.maximumf %26, %27 : vector<32x64xf32>
    %29 = tpu.iota {dimensions = array<i32: 0>} : vector<32x64xi32>
    %c8_i32 = arith.constant 8 : i32
    %c0_i32 = arith.constant 0 : i32
    %30 = arith.cmpi eq, %c8_i32, %c0_i32 : i32
    %c1_i32 = arith.constant 1 : i32
    %31 = arith.select %30, %c1_i32, %c8_i32 : i32
    %32 = vector.broadcast %31 : i32 to vector<32x64xi32>
    %33 = arith.remsi %29, %32 : vector<32x64xi32>
    %c0_i32_12 = arith.constant 0 : i32
    %34 = vector.broadcast %c0_i32_12 : i32 to vector<32x64xi32>
    %35 = arith.cmpi ne, %33, %34 : vector<32x64xi32>
    %c0_i32_13 = arith.constant 0 : i32
    %36 = vector.broadcast %c0_i32_13 : i32 to vector<32x64xi32>
    %37 = arith.cmpi slt, %33, %36 : vector<32x64xi32>
    %c0_i32_14 = arith.constant 0 : i32
    %38 = arith.cmpi slt, %31, %c0_i32_14 : i32
    %39 = vector.broadcast %38 : i1 to vector<32x64xi1>
    %40 = vector.broadcast %39 : vector<32x64xi1> to vector<32x64xi1>
    %41 = arith.xori %37, %40 : vector<32x64xi1>
    %42 = arith.andi %41, %35 : vector<32x64xi1>
    %43 = vector.broadcast %31 : i32 to vector<32x64xi32>
    %44 = arith.addi %33, %43 : vector<32x64xi32>
    %45 = arith.select %42, %44, %33 : vector<32x64xi1>, vector<32x64xi32>
    %c4_i32 = arith.constant 4 : i32
    %46 = vector.broadcast %c4_i32 : i32 to vector<32x64xi32>
    %47 = arith.cmpi slt, %45, %46 : vector<32x64xi32>
    %cst = arith.constant 0.000000e+00 : f32
    %48 = vector.broadcast %cst : f32 to vector<16x64xf32>
    %cst_15 = arith.constant 0.000000e+00 : f32
    %49 = vector.broadcast %cst_15 : f32 to vector<16x64xf32>
    %cst_16 = arith.constant 0.000000e+00 : f32
    %50 = vector.broadcast %cst_16 : f32 to vector<32x64xf32>
    %51 = arith.select %47, %28, %50 : vector<32x64xi1>, vector<32x64xf32>
    %52 = tpu.concatenate %48, %51, %49 in 0 : vector<16x64xf32>, vector<32x64xf32>, vector<16x64xf32> -> vector<64x64xf32>
    %53 = vector.extract_strided_slice %52 {offsets = [7, 0], sizes = [32, 64], strides = [1, 1]} : vector<64x64xf32> to vector<32x64xf32>
    %54 = arith.truncf %53 : vector<32x64xf32> to vector<32x64xbf16>
    %c0_17 = arith.constant 0 : index
    %c0_18 = arith.constant 0 : index
    %c0_19 = arith.constant 0 : index
    %55 = vector.load %arg2[%c0_17, %c0_18, %c0_19] : memref<9x64x64xbf16, #tpu.memory_space<vmem>>, vector<1x64x64xbf16>
    %56 = vector.shape_cast %55 : vector<1x64x64xbf16> to vector<64x64xbf16>
    %cst_20 = arith.constant dense<0.000000e+00> : vector<32x64xf32>
    %57 = tpu.matmul %54, %56, %cst_20 {dimension_numbers = #tpu.dot_dimension_numbers<[1], [0], [0], [1], [0, 0, 1, 1], [], []>} : vector<32x64xbf16>, vector<64x64xbf16>, vector<32x64xf32> -> vector<32x64xf32>
    %58 = vector.extract_strided_slice %52 {offsets = [8, 0], sizes = [32, 64], strides = [1, 1]} : vector<64x64xf32> to vector<32x64xf32>
    %59 = arith.truncf %58 : vector<32x64xf32> to vector<32x64xbf16>
    %c1_21 = arith.constant 1 : index
    %c0_22 = arith.constant 0 : index
    %c0_23 = arith.constant 0 : index
    %60 = vector.load %arg2[%c1_21, %c0_22, %c0_23] : memref<9x64x64xbf16, #tpu.memory_space<vmem>>, vector<1x64x64xbf16>
    %61 = vector.shape_cast %60 : vector<1x64x64xbf16> to vector<64x64xbf16>
    %cst_24 = arith.constant dense<0.000000e+00> : vector<32x64xf32>
    %62 = tpu.matmul %59, %61, %cst_24 {dimension_numbers = #tpu.dot_dimension_numbers<[1], [0], [0], [1], [0, 0, 1, 1], [], []>} : vector<32x64xbf16>, vector<64x64xbf16>, vector<32x64xf32> -> vector<32x64xf32>
    %63 = arith.addf %57, %62 : vector<32x64xf32>
    %64 = vector.extract_strided_slice %52 {offsets = [9, 0], sizes = [32, 64], strides = [1, 1]} : vector<64x64xf32> to vector<32x64xf32>
    %65 = arith.truncf %64 : vector<32x64xf32> to vector<32x64xbf16>
    %c2_25 = arith.constant 2 : index
    %c0_26 = arith.constant 0 : index
    %c0_27 = arith.constant 0 : index
    %66 = vector.load %arg2[%c2_25, %c0_26, %c0_27] : memref<9x64x64xbf16, #tpu.memory_space<vmem>>, vector<1x64x64xbf16>
    %67 = vector.shape_cast %66 : vector<1x64x64xbf16> to vector<64x64xbf16>
    %cst_28 = arith.constant dense<0.000000e+00> : vector<32x64xf32>
    %68 = tpu.matmul %65, %67, %cst_28 {dimension_numbers = #tpu.dot_dimension_numbers<[1], [0], [0], [1], [0, 0, 1, 1], [], []>} : vector<32x64xbf16>, vector<64x64xbf16>, vector<32x64xf32> -> vector<32x64xf32>
    %69 = arith.addf %63, %68 : vector<32x64xf32>
    %70 = vector.extract_strided_slice %52 {offsets = [15, 0], sizes = [32, 64], strides = [1, 1]} : vector<64x64xf32> to vector<32x64xf32>
    %71 = arith.truncf %70 : vector<32x64xf32> to vector<32x64xbf16>
    %c3_29 = arith.constant 3 : index
    %c0_30 = arith.constant 0 : index
    %c0_31 = arith.constant 0 : index
    %72 = vector.load %arg2[%c3_29, %c0_30, %c0_31] : memref<9x64x64xbf16, #tpu.memory_space<vmem>>, vector<1x64x64xbf16>
    %73 = vector.shape_cast %72 : vector<1x64x64xbf16> to vector<64x64xbf16>
    %cst_32 = arith.constant dense<0.000000e+00> : vector<32x64xf32>
    %74 = tpu.matmul %71, %73, %cst_32 {dimension_numbers = #tpu.dot_dimension_numbers<[1], [0], [0], [1], [0, 0, 1, 1], [], []>} : vector<32x64xbf16>, vector<64x64xbf16>, vector<32x64xf32> -> vector<32x64xf32>
    %75 = arith.addf %69, %74 : vector<32x64xf32>
    %76 = vector.extract_strided_slice %52 {offsets = [16, 0], sizes = [32, 64], strides = [1, 1]} : vector<64x64xf32> to vector<32x64xf32>
    %77 = arith.truncf %76 : vector<32x64xf32> to vector<32x64xbf16>
    %c4 = arith.constant 4 : index
    %c0_33 = arith.constant 0 : index
    %c0_34 = arith.constant 0 : index
    %78 = vector.load %arg2[%c4, %c0_33, %c0_34] : memref<9x64x64xbf16, #tpu.memory_space<vmem>>, vector<1x64x64xbf16>
    %79 = vector.shape_cast %78 : vector<1x64x64xbf16> to vector<64x64xbf16>
    %cst_35 = arith.constant dense<0.000000e+00> : vector<32x64xf32>
    %80 = tpu.matmul %77, %79, %cst_35 {dimension_numbers = #tpu.dot_dimension_numbers<[1], [0], [0], [1], [0, 0, 1, 1], [], []>} : vector<32x64xbf16>, vector<64x64xbf16>, vector<32x64xf32> -> vector<32x64xf32>
    %81 = arith.addf %75, %80 : vector<32x64xf32>
    %82 = vector.extract_strided_slice %52 {offsets = [17, 0], sizes = [32, 64], strides = [1, 1]} : vector<64x64xf32> to vector<32x64xf32>
    %83 = arith.truncf %82 : vector<32x64xf32> to vector<32x64xbf16>
    %c5 = arith.constant 5 : index
    %c0_36 = arith.constant 0 : index
    %c0_37 = arith.constant 0 : index
    %84 = vector.load %arg2[%c5, %c0_36, %c0_37] : memref<9x64x64xbf16, #tpu.memory_space<vmem>>, vector<1x64x64xbf16>
    %85 = vector.shape_cast %84 : vector<1x64x64xbf16> to vector<64x64xbf16>
    %cst_38 = arith.constant dense<0.000000e+00> : vector<32x64xf32>
    %86 = tpu.matmul %83, %85, %cst_38 {dimension_numbers = #tpu.dot_dimension_numbers<[1], [0], [0], [1], [0, 0, 1, 1], [], []>} : vector<32x64xbf16>, vector<64x64xbf16>, vector<32x64xf32> -> vector<32x64xf32>
    %87 = arith.addf %81, %86 : vector<32x64xf32>
    %88 = vector.extract_strided_slice %52 {offsets = [23, 0], sizes = [32, 64], strides = [1, 1]} : vector<64x64xf32> to vector<32x64xf32>
    %89 = arith.truncf %88 : vector<32x64xf32> to vector<32x64xbf16>
    %c6 = arith.constant 6 : index
    %c0_39 = arith.constant 0 : index
    %c0_40 = arith.constant 0 : index
    %90 = vector.load %arg2[%c6, %c0_39, %c0_40] : memref<9x64x64xbf16, #tpu.memory_space<vmem>>, vector<1x64x64xbf16>
    %91 = vector.shape_cast %90 : vector<1x64x64xbf16> to vector<64x64xbf16>
    %cst_41 = arith.constant dense<0.000000e+00> : vector<32x64xf32>
    %92 = tpu.matmul %89, %91, %cst_41 {dimension_numbers = #tpu.dot_dimension_numbers<[1], [0], [0], [1], [0, 0, 1, 1], [], []>} : vector<32x64xbf16>, vector<64x64xbf16>, vector<32x64xf32> -> vector<32x64xf32>
    %93 = arith.addf %87, %92 : vector<32x64xf32>
    %94 = vector.extract_strided_slice %52 {offsets = [24, 0], sizes = [32, 64], strides = [1, 1]} : vector<64x64xf32> to vector<32x64xf32>
    %95 = arith.truncf %94 : vector<32x64xf32> to vector<32x64xbf16>
    %c7 = arith.constant 7 : index
    %c0_42 = arith.constant 0 : index
    %c0_43 = arith.constant 0 : index
    %96 = vector.load %arg2[%c7, %c0_42, %c0_43] : memref<9x64x64xbf16, #tpu.memory_space<vmem>>, vector<1x64x64xbf16>
    %97 = vector.shape_cast %96 : vector<1x64x64xbf16> to vector<64x64xbf16>
    %cst_44 = arith.constant dense<0.000000e+00> : vector<32x64xf32>
    %98 = tpu.matmul %95, %97, %cst_44 {dimension_numbers = #tpu.dot_dimension_numbers<[1], [0], [0], [1], [0, 0, 1, 1], [], []>} : vector<32x64xbf16>, vector<64x64xbf16>, vector<32x64xf32> -> vector<32x64xf32>
    %99 = arith.addf %93, %98 : vector<32x64xf32>
    %100 = vector.extract_strided_slice %52 {offsets = [25, 0], sizes = [32, 64], strides = [1, 1]} : vector<64x64xf32> to vector<32x64xf32>
    %101 = arith.truncf %100 : vector<32x64xf32> to vector<32x64xbf16>
    %c8 = arith.constant 8 : index
    %c0_45 = arith.constant 0 : index
    %c0_46 = arith.constant 0 : index
    %102 = vector.load %arg2[%c8, %c0_45, %c0_46] : memref<9x64x64xbf16, #tpu.memory_space<vmem>>, vector<1x64x64xbf16>
    %103 = vector.shape_cast %102 : vector<1x64x64xbf16> to vector<64x64xbf16>
    %cst_47 = arith.constant dense<0.000000e+00> : vector<32x64xf32>
    %104 = tpu.matmul %101, %103, %cst_47 {dimension_numbers = #tpu.dot_dimension_numbers<[1], [0], [0], [1], [0, 0, 1, 1], [], []>} : vector<32x64xbf16>, vector<64x64xbf16>, vector<32x64xf32> -> vector<32x64xf32>
    %105 = arith.addf %99, %104 : vector<32x64xf32>
    %c0_48 = arith.constant 0 : index
    %c0_49 = arith.constant 0 : index
    %106 = vector.load %arg3[%c0_48, %c0_49] : memref<1x64xf32, #tpu.memory_space<vmem>>, vector<1x64xf32>
    %107 = vector.broadcast %106 : vector<1x64xf32> to vector<32x64xf32>
    %108 = arith.mulf %105, %107 : vector<32x64xf32>
    %c0_50 = arith.constant 0 : index
    %c0_51 = arith.constant 0 : index
    %109 = vector.load %arg4[%c0_50, %c0_51] : memref<1x64xf32, #tpu.memory_space<vmem>>, vector<1x64xf32>
    %110 = vector.broadcast %109 : vector<1x64xf32> to vector<32x64xf32>
    %111 = arith.addf %108, %110 : vector<32x64xf32>
    %cst_52 = arith.constant 0.000000e+00 : f32
    %112 = vector.broadcast %cst_52 : f32 to vector<32x64xf32>
    %113 = arith.maximumf %111, %112 : vector<32x64xf32>
    %cst_53 = arith.constant 0.000000e+00 : f32
    %114 = vector.broadcast %cst_53 : f32 to vector<32x64xf32>
    %115 = arith.select %47, %113, %114 : vector<32x64xi1>, vector<32x64xf32>
    %116 = tpu.concatenate %48, %115, %49 in 0 : vector<16x64xf32>, vector<32x64xf32>, vector<16x64xf32> -> vector<64x64xf32>
    %117 = vector.extract_strided_slice %116 {offsets = [7, 0], sizes = [32, 64], strides = [1, 1]} : vector<64x64xf32> to vector<32x64xf32>
    %118 = arith.truncf %117 : vector<32x64xf32> to vector<32x64xbf16>
    %c0_54 = arith.constant 0 : index
    %c0_55 = arith.constant 0 : index
    %c0_56 = arith.constant 0 : index
    %119 = vector.load %arg5[%c0_54, %c0_55, %c0_56] : memref<9x64x64xbf16, #tpu.memory_space<vmem>>, vector<1x64x64xbf16>
    %120 = vector.shape_cast %119 : vector<1x64x64xbf16> to vector<64x64xbf16>
    %cst_57 = arith.constant dense<0.000000e+00> : vector<32x64xf32>
    %121 = tpu.matmul %118, %120, %cst_57 {dimension_numbers = #tpu.dot_dimension_numbers<[1], [0], [0], [1], [0, 0, 1, 1], [], []>} : vector<32x64xbf16>, vector<64x64xbf16>, vector<32x64xf32> -> vector<32x64xf32>
    %122 = vector.extract_strided_slice %116 {offsets = [8, 0], sizes = [32, 64], strides = [1, 1]} : vector<64x64xf32> to vector<32x64xf32>
    %123 = arith.truncf %122 : vector<32x64xf32> to vector<32x64xbf16>
    %c1_58 = arith.constant 1 : index
    %c0_59 = arith.constant 0 : index
    %c0_60 = arith.constant 0 : index
    %124 = vector.load %arg5[%c1_58, %c0_59, %c0_60] : memref<9x64x64xbf16, #tpu.memory_space<vmem>>, vector<1x64x64xbf16>
    %125 = vector.shape_cast %124 : vector<1x64x64xbf16> to vector<64x64xbf16>
    %cst_61 = arith.constant dense<0.000000e+00> : vector<32x64xf32>
    %126 = tpu.matmul %123, %125, %cst_61 {dimension_numbers = #tpu.dot_dimension_numbers<[1], [0], [0], [1], [0, 0, 1, 1], [], []>} : vector<32x64xbf16>, vector<64x64xbf16>, vector<32x64xf32> -> vector<32x64xf32>
    %127 = arith.addf %121, %126 : vector<32x64xf32>
    %128 = vector.extract_strided_slice %116 {offsets = [9, 0], sizes = [32, 64], strides = [1, 1]} : vector<64x64xf32> to vector<32x64xf32>
    %129 = arith.truncf %128 : vector<32x64xf32> to vector<32x64xbf16>
    %c2_62 = arith.constant 2 : index
    %c0_63 = arith.constant 0 : index
    %c0_64 = arith.constant 0 : index
    %130 = vector.load %arg5[%c2_62, %c0_63, %c0_64] : memref<9x64x64xbf16, #tpu.memory_space<vmem>>, vector<1x64x64xbf16>
    %131 = vector.shape_cast %130 : vector<1x64x64xbf16> to vector<64x64xbf16>
    %cst_65 = arith.constant dense<0.000000e+00> : vector<32x64xf32>
    %132 = tpu.matmul %129, %131, %cst_65 {dimension_numbers = #tpu.dot_dimension_numbers<[1], [0], [0], [1], [0, 0, 1, 1], [], []>} : vector<32x64xbf16>, vector<64x64xbf16>, vector<32x64xf32> -> vector<32x64xf32>
    %133 = arith.addf %127, %132 : vector<32x64xf32>
    %134 = vector.extract_strided_slice %116 {offsets = [15, 0], sizes = [32, 64], strides = [1, 1]} : vector<64x64xf32> to vector<32x64xf32>
    %135 = arith.truncf %134 : vector<32x64xf32> to vector<32x64xbf16>
    %c3_66 = arith.constant 3 : index
    %c0_67 = arith.constant 0 : index
    %c0_68 = arith.constant 0 : index
    %136 = vector.load %arg5[%c3_66, %c0_67, %c0_68] : memref<9x64x64xbf16, #tpu.memory_space<vmem>>, vector<1x64x64xbf16>
    %137 = vector.shape_cast %136 : vector<1x64x64xbf16> to vector<64x64xbf16>
    %cst_69 = arith.constant dense<0.000000e+00> : vector<32x64xf32>
    %138 = tpu.matmul %135, %137, %cst_69 {dimension_numbers = #tpu.dot_dimension_numbers<[1], [0], [0], [1], [0, 0, 1, 1], [], []>} : vector<32x64xbf16>, vector<64x64xbf16>, vector<32x64xf32> -> vector<32x64xf32>
    %139 = arith.addf %133, %138 : vector<32x64xf32>
    %140 = vector.extract_strided_slice %116 {offsets = [16, 0], sizes = [32, 64], strides = [1, 1]} : vector<64x64xf32> to vector<32x64xf32>
    %141 = arith.truncf %140 : vector<32x64xf32> to vector<32x64xbf16>
    %c4_70 = arith.constant 4 : index
    %c0_71 = arith.constant 0 : index
    %c0_72 = arith.constant 0 : index
    %142 = vector.load %arg5[%c4_70, %c0_71, %c0_72] : memref<9x64x64xbf16, #tpu.memory_space<vmem>>, vector<1x64x64xbf16>
    %143 = vector.shape_cast %142 : vector<1x64x64xbf16> to vector<64x64xbf16>
    %cst_73 = arith.constant dense<0.000000e+00> : vector<32x64xf32>
    %144 = tpu.matmul %141, %143, %cst_73 {dimension_numbers = #tpu.dot_dimension_numbers<[1], [0], [0], [1], [0, 0, 1, 1], [], []>} : vector<32x64xbf16>, vector<64x64xbf16>, vector<32x64xf32> -> vector<32x64xf32>
    %145 = arith.addf %139, %144 : vector<32x64xf32>
    %146 = vector.extract_strided_slice %116 {offsets = [17, 0], sizes = [32, 64], strides = [1, 1]} : vector<64x64xf32> to vector<32x64xf32>
    %147 = arith.truncf %146 : vector<32x64xf32> to vector<32x64xbf16>
    %c5_74 = arith.constant 5 : index
    %c0_75 = arith.constant 0 : index
    %c0_76 = arith.constant 0 : index
    %148 = vector.load %arg5[%c5_74, %c0_75, %c0_76] : memref<9x64x64xbf16, #tpu.memory_space<vmem>>, vector<1x64x64xbf16>
    %149 = vector.shape_cast %148 : vector<1x64x64xbf16> to vector<64x64xbf16>
    %cst_77 = arith.constant dense<0.000000e+00> : vector<32x64xf32>
    %150 = tpu.matmul %147, %149, %cst_77 {dimension_numbers = #tpu.dot_dimension_numbers<[1], [0], [0], [1], [0, 0, 1, 1], [], []>} : vector<32x64xbf16>, vector<64x64xbf16>, vector<32x64xf32> -> vector<32x64xf32>
    %151 = arith.addf %145, %150 : vector<32x64xf32>
    %152 = vector.extract_strided_slice %116 {offsets = [23, 0], sizes = [32, 64], strides = [1, 1]} : vector<64x64xf32> to vector<32x64xf32>
    %153 = arith.truncf %152 : vector<32x64xf32> to vector<32x64xbf16>
    %c6_78 = arith.constant 6 : index
    %c0_79 = arith.constant 0 : index
    %c0_80 = arith.constant 0 : index
    %154 = vector.load %arg5[%c6_78, %c0_79, %c0_80] : memref<9x64x64xbf16, #tpu.memory_space<vmem>>, vector<1x64x64xbf16>
    %155 = vector.shape_cast %154 : vector<1x64x64xbf16> to vector<64x64xbf16>
    %cst_81 = arith.constant dense<0.000000e+00> : vector<32x64xf32>
    %156 = tpu.matmul %153, %155, %cst_81 {dimension_numbers = #tpu.dot_dimension_numbers<[1], [0], [0], [1], [0, 0, 1, 1], [], []>} : vector<32x64xbf16>, vector<64x64xbf16>, vector<32x64xf32> -> vector<32x64xf32>
    %157 = arith.addf %151, %156 : vector<32x64xf32>
    %158 = vector.extract_strided_slice %116 {offsets = [24, 0], sizes = [32, 64], strides = [1, 1]} : vector<64x64xf32> to vector<32x64xf32>
    %159 = arith.truncf %158 : vector<32x64xf32> to vector<32x64xbf16>
    %c7_82 = arith.constant 7 : index
    %c0_83 = arith.constant 0 : index
    %c0_84 = arith.constant 0 : index
    %160 = vector.load %arg5[%c7_82, %c0_83, %c0_84] : memref<9x64x64xbf16, #tpu.memory_space<vmem>>, vector<1x64x64xbf16>
    %161 = vector.shape_cast %160 : vector<1x64x64xbf16> to vector<64x64xbf16>
    %cst_85 = arith.constant dense<0.000000e+00> : vector<32x64xf32>
    %162 = tpu.matmul %159, %161, %cst_85 {dimension_numbers = #tpu.dot_dimension_numbers<[1], [0], [0], [1], [0, 0, 1, 1], [], []>} : vector<32x64xbf16>, vector<64x64xbf16>, vector<32x64xf32> -> vector<32x64xf32>
    %163 = arith.addf %157, %162 : vector<32x64xf32>
    %164 = vector.extract_strided_slice %116 {offsets = [25, 0], sizes = [32, 64], strides = [1, 1]} : vector<64x64xf32> to vector<32x64xf32>
    %165 = arith.truncf %164 : vector<32x64xf32> to vector<32x64xbf16>
    %c8_86 = arith.constant 8 : index
    %c0_87 = arith.constant 0 : index
    %c0_88 = arith.constant 0 : index
    %166 = vector.load %arg5[%c8_86, %c0_87, %c0_88] : memref<9x64x64xbf16, #tpu.memory_space<vmem>>, vector<1x64x64xbf16>
    %167 = vector.shape_cast %166 : vector<1x64x64xbf16> to vector<64x64xbf16>
    %cst_89 = arith.constant dense<0.000000e+00> : vector<32x64xf32>
    %168 = tpu.matmul %165, %167, %cst_89 {dimension_numbers = #tpu.dot_dimension_numbers<[1], [0], [0], [1], [0, 0, 1, 1], [], []>} : vector<32x64xbf16>, vector<64x64xbf16>, vector<32x64xf32> -> vector<32x64xf32>
    %169 = arith.addf %163, %168 : vector<32x64xf32>
    %c0_90 = arith.constant 0 : index
    %c0_91 = arith.constant 0 : index
    %170 = vector.load %arg6[%c0_90, %c0_91] : memref<1x64xf32, #tpu.memory_space<vmem>>, vector<1x64xf32>
    %171 = vector.broadcast %170 : vector<1x64xf32> to vector<32x64xf32>
    %172 = arith.mulf %169, %171 : vector<32x64xf32>
    %c0_92 = arith.constant 0 : index
    %c0_93 = arith.constant 0 : index
    %173 = vector.load %arg7[%c0_92, %c0_93] : memref<1x64xf32, #tpu.memory_space<vmem>>, vector<1x64xf32>
    %174 = vector.broadcast %173 : vector<1x64xf32> to vector<32x64xf32>
    %175 = arith.addf %172, %174 : vector<32x64xf32>
    %cst_94 = arith.constant 0.000000e+00 : f32
    %176 = vector.broadcast %cst_94 : f32 to vector<32x64xf32>
    %177 = arith.select %47, %175, %176 : vector<32x64xi1>, vector<32x64xf32>
    %cst_95 = arith.constant dense<0.000000e+00> : vector<64xf32>
    %178 = vector.multi_reduction <add>, %177, %cst_95 [0] : vector<32x64xf32> to vector<64xf32>
    %179 = vector.shape_cast %178 : vector<64xf32> to vector<1x64xf32>
    %cst_96 = arith.constant 6.250000e-02 : f32
    %180 = vector.broadcast %cst_96 : f32 to vector<1x64xf32>
    %181 = arith.mulf %179, %180 : vector<1x64xf32>
    %c0_97 = arith.constant 0 : index
    %c0_98 = arith.constant 0 : index
    %182 = vector.load %arg8[%c0_97, %c0_98] : memref<64x1024xf32, #tpu.memory_space<vmem>>, vector<64x1024xf32>
    %cst_99 = arith.constant dense<0.000000e+00> : vector<1x1024xf32>
    %183 = tpu.matmul %181, %182, %cst_99 {dimension_numbers = #tpu.dot_dimension_numbers<[1], [0], [0], [1], [0, 0, 1, 1], [], []>} : vector<1x64xf32>, vector<64x1024xf32>, vector<1x1024xf32> -> vector<1x1024xf32>
    %c0_100 = arith.constant 0 : index
    %c0_101 = arith.constant 0 : index
    %184 = vector.load %arg9[%c0_100, %c0_101] : memref<1x1024xf32, #tpu.memory_space<vmem>>, vector<1x1024xf32>
    %185 = arith.addf %183, %184 : vector<1x1024xf32>
    %c0_102 = arith.constant 0 : index
    %c0_103 = arith.constant 0 : index
    %c0_104 = arith.constant 0 : index
    %186 = vector.load %arg10[%c0_102, %c0_103, %c0_104] : memref<1x1x1024xf32, #tpu.memory_space<vmem>>, vector<1x1x1024xf32>
    %187 = vector.shape_cast %186 : vector<1x1x1024xf32> to vector<1x1024xf32>
    %188 = vector.shape_cast %185 : vector<1x1024xf32> to vector<1x1x1024xf32>
    tpu.vector_store %arg10[%c0_102, %c0_103, %c0_104], %188 {strides = array<i32>} : memref<1x1x1024xf32, #tpu.memory_space<vmem>>, vector<1x1x1024xf32>,
    return
  }
  func.func @transform_0(%arg0: i32) -> (i32, i32, i32, i32) {
    %c0_i32 = arith.constant 0 : i32
    %c0_i32_0 = arith.constant 0 : i32
    %c0_i32_1 = arith.constant 0 : i32
    %c0_i32_2 = arith.constant 0 : i32
    return %arg0, %c0_i32, %c0_i32_0, %c0_i32_1 : i32, i32, i32, i32
  }
  func.func @transform_1(%arg0: i32) -> (i32, i32, i32) {
    %c0_i32 = arith.constant 0 : i32
    %c0_i32_0 = arith.constant 0 : i32
    %c0_i32_1 = arith.constant 0 : i32
    %c0_i32_2 = arith.constant 0 : i32
    return %c0_i32, %c0_i32_0, %c0_i32_1 : i32, i32, i32
  }
  func.func @transform_2(%arg0: i32) -> (i32, i32) {
    %c0_i32 = arith.constant 0 : i32
    %c0_i32_0 = arith.constant 0 : i32
    %c0_i32_1 = arith.constant 0 : i32
    return %c0_i32, %c0_i32_0 : i32, i32
  }
  func.func @transform_3(%arg0: i32) -> (i32, i32) {
    %c0_i32 = arith.constant 0 : i32
    %c0_i32_0 = arith.constant 0 : i32
    %c0_i32_1 = arith.constant 0 : i32
    return %c0_i32, %c0_i32_0 : i32, i32
  }
  func.func @transform_4(%arg0: i32) -> (i32, i32, i32) {
    %c0_i32 = arith.constant 0 : i32
    %c0_i32_0 = arith.constant 0 : i32
    %c0_i32_1 = arith.constant 0 : i32
    %c0_i32_2 = arith.constant 0 : i32
    return %c0_i32, %c0_i32_0, %c0_i32_1 : i32, i32, i32
  }
  func.func @transform_5(%arg0: i32) -> (i32, i32) {
    %c0_i32 = arith.constant 0 : i32
    %c0_i32_0 = arith.constant 0 : i32
    %c0_i32_1 = arith.constant 0 : i32
    return %c0_i32, %c0_i32_0 : i32, i32
  }
  func.func @transform_6(%arg0: i32) -> (i32, i32) {
    %c0_i32 = arith.constant 0 : i32
    %c0_i32_0 = arith.constant 0 : i32
    %c0_i32_1 = arith.constant 0 : i32
    return %c0_i32, %c0_i32_0 : i32, i32
  }
  func.func @transform_7(%arg0: i32) -> (i32, i32) {
    %c0_i32 = arith.constant 0 : i32
    %c0_i32_0 = arith.constant 0 : i32
    %c0_i32_1 = arith.constant 0 : i32
    return %c0_i32, %c0_i32_0 : i32, i32
  }
  func.func @transform_8(%arg0: i32) -> (i32, i32) {
    %c0_i32 = arith.constant 0 : i32
    %c0_i32_0 = arith.constant 0 : i32
    %c0_i32_1 = arith.constant 0 : i32
    return %c0_i32, %c0_i32_0 : i32, i32
  }
  func.func @transform_9(%arg0: i32) -> (i32, i32, i32) {
    %c0_i32 = arith.constant 0 : i32
    %c0_i32_0 = arith.constant 0 : i32
    %c0_i32_1 = arith.constant 0 : i32
    return %arg0, %c0_i32, %c0_i32_0 : i32, i32, i32
  }
}

</mosaic_0001>

<bundles_post_ra>
// kernel: net_single_layer_forward.2
= control target key start
LH: loop header
LB: loop body
LE: loop exit
PB: predicated region body
PF: predicated region fallthrough
CT: control target
= control target key end

     0   :  { %s735_s15 = smov 0   ;;  %s846_s0 = inlined_call_operand.vmem [shape: bf16[128,256], index: 0, kind: input, shape index: {}]   ;;  %s847_s1 = inlined_call_operand.vmem [shape: bf16[256,64], index: 1, kind: input, shape index: {}]   ;;  %s848_s2 = inlined_call_operand.vmem [shape: f32[1,64], index: 2, kind: input, shape index: {}]   ;;  %s849_s3 = inlined_call_operand.vmem [shape: f32[1,64], index: 3, kind: input, shape index: {}]   ;;  %s850_s4 = inlined_call_operand.vmem [shape: bf16[128,64], index: 4, kind: output, shape index: {}]  }
   0x1 LB: > { %s543_s16 = sadd.s32 4294967295, %s708_s15   ;;  %p547_p0 = scmp.ge.s32.totalorder %s708_s15, 1  ;;  %s708_s15 = sphi %s735_s15, %s14_s15  }
   0x2   : > { %p164_p1 = scmp.lt.s32.totalorder %s708_s15, 3 }
   0x4   : > { %p165_p2 = pnand %p547_p0, %p164_p1 }
   0x5   : > { %s548_s29 = sshll.u32 (!%p165_p2), %s543_s16, 3 }
   0x6   : > { %168 = sbr.rel (%p165_p2) target bundleno = 211 (0xd3), region = 36  ;;  %p192_p3 = scmp.lt.s32.totalorder (!%p165_p2), %s548_s29, 15 }
   0xb   : > { %v667_v0 = vld [vmem:[%s847_s1 + $0x38] sm:$0xff]  ;;  %v666_v2 = vld [vmem:[%s847_s1 + $0x30] sm:$0xff]  ;;  %v665_v4 = vld [vmem:[%s847_s1 + $0x28] sm:$0xff]  ;;  %s852_s29 = smov (!%p192_p3, %s548_s29), 15  ;;  %vm478_vm0 = vcmask 519168  }
   0xc   : > { %v675_v1 = vld [vmem:[%s847_s1 + $0x78] sm:$0xff]  ;;  %380 = vmatpush.bf16.msra.mxu0 %v667_v0  ;;  %676 = vmatpush.bf16.msra.mxu2 %v667_v0  ;;  %v674_v3 = vld [vmem:[%s847_s1 + $0x70] sm:$0xff]  ;;  %v673_v5 = vld [vmem:[%s847_s1 + $0x68] sm:$0xff]  ;;  %s651_s17 = sshll.u32 %s852_s29, 3  ;;  %s552_s8 = sshll.u32 %s852_s29, 2 }
   0xd   : > { %409 = vmatpush.bf16.msra.mxu1 %v675_v1  ;;  %684 = vmatpush.bf16.msra.mxu3 %v675_v1  ;;  %v664_v6 = vld [vmem:[%s847_s1 + $0x20] sm:$0xff]  ;;  %v663_v8 = vld [vmem:[%s847_s1 + $0x18] sm:$0xff]  ;;  %v662_v10 = vld [vmem:[%s847_s1 + $0x10] sm:$0xff]  ;;  %s788_s22 = scalar_lea.vmem %s846_s0, %s651_s17  ;;  %s825_s11 = scalar_lea.vmem %s850_s4, %s552_s8 }
   0xe   : > { %v672_v7 = vld [vmem:[%s847_s1 + $0x60] sm:$0xff]  ;;  %v671_v9 = vld [vmem:[%s847_s1 + $0x58] sm:$0xff]  ;;  %v670_v11 = vld [vmem:[%s847_s1 + $0x50] sm:$0xff] }
   0xf   : > { %v661_v12 = vld [vmem:[%s847_s1 + $0x8] sm:$0xff]  ;;  %v660_v14 = vld [vmem:[%s847_s1] sm:$0xff]  ;;  %v563_v28 = vld [vmem:[%s788_s22 + $0x10] sm:$0xf] }
  0x10   : > { %381 = vmatpush.bf16.msra.mxu0 %v666_v2  ;;  %677 = vmatpush.bf16.msra.mxu2 %v666_v2  ;;  %v669_v13 = vld [vmem:[%s847_s1 + $0x48] sm:$0xff]  ;;  %v668_v15 = vld [vmem:[%s847_s1 + $0x40] sm:$0xff]  ;;  %v655_v29 = vld [vmem:[%s788_s22 + $0x14] sm:$0xf0] }
  0x11   : > { %410 = vmatpush.bf16.msra.mxu1 %v674_v3  ;;  %685 = vmatpush.bf16.msra.mxu3 %v674_v3  ;;  %v555_v16 = vld [vmem:[%s788_s22] sm:$0xf]  ;;  %v653_v17 = vld [vmem:[%s788_s22 + $0x4] sm:$0xf0]  ;;  %v652_v20 = vld [vmem:[%s788_s22 + $0x4] sm:$0xf]  ;;  %v564_v36 = vor.u32 %v655_v29, %v563_v28 }
  0x12   : > { %v571_v18 = vld [vmem:[%s788_s22 + $0x20] sm:$0xf]  ;;  %v657_v19 = vld [vmem:[%s788_s22 + $0x24] sm:$0xf0]  ;;  %v557_v21 = vld [vmem:[%s788_s22 + $0x8] sm:$0xf0]  ;;  %v556_v24 = vor.u32 %v653_v17, %v555_v16 }
  0x13   : > { %v656_v22 = vld [vmem:[%s788_s22 + $0x24] sm:$0xf]  ;;  %v573_v23 = vld [vmem:[%s788_s22 + $0x28] sm:$0xf0]  ;;  %v572_v25 = vor.u32 %v657_v19, %v571_v18  ;;  %v560_v26 = vor.u32 %v652_v20, %v557_v21  ;;  %v579_v30 = vld [vmem:[%s788_s22 + $0x30] sm:$0xf] }
  0x14   : > { %382 = vmatpush.bf16.msra.mxu0 %v665_v4  ;;  %678 = vmatpush.bf16.msra.mxu2 %v665_v4  ;;  %v576_v27 = vor.u32 %v656_v22, %v573_v23  ;;  %v659_v31 = vld [vmem:[%s788_s22 + $0x34] sm:$0xf0]  ;;  %v654_v32 = vld [vmem:[%s788_s22 + $0x14] sm:$0xf]  ;;  %v565_v33 = vld [vmem:[%s788_s22 + $0x18] sm:$0xf0] }
  0x15   : > { %411 = vmatpush.bf16.msra.mxu1 %v673_v5  ;;  %686 = vmatpush.bf16.msra.mxu3 %v673_v5  ;;  %v658_v34 = vld [vmem:[%s788_s22 + $0x34] sm:$0xf]  ;;  %v581_v35 = vld [vmem:[%s788_s22 + $0x38] sm:$0xf0]  ;;  %v580_v37 = vor.u32 %v659_v31, %v579_v30  ;;  %v568_v38 = vor.u32 %v654_v32, %v565_v33  ;;  %v700_v41 = vld [vmem:[%s848_s2] ss:$0 sm:$0xff] }
  0x16   : > { %v584_v39 = vor.u32 %v658_v34, %v581_v35  ;;  %v701_v44 = vld [vmem:[%s849_s3] ss:$0 sm:$0xff] }
  0x18   : > { %383 = vmatpush.bf16.msra.mxu0 %v664_v6  ;;  %679 = vmatpush.bf16.msra.mxu2 %v664_v6 }
  0x19   : > { %412 = vmatpush.bf16.msra.mxu1 %v672_v7  ;;  %687 = vmatpush.bf16.msra.mxu3 %v672_v7 }
  0x1c   : > { %384 = vmatpush.bf16.msra.mxu0 %v663_v8  ;;  %680 = vmatpush.bf16.msra.mxu2 %v663_v8 }
  0x1d   : > { %413 = vmatpush.bf16.msra.mxu1 %v671_v9  ;;  %688 = vmatpush.bf16.msra.mxu3 %v671_v9 }
  0x20   : > { %385 = vmatpush.bf16.msra.mxu0 %v662_v10  ;;  %681 = vmatpush.bf16.msra.mxu2 %v662_v10 }
  0x21   : > { %414 = vmatpush.bf16.msra.mxu1 %v670_v11  ;;  %689 = vmatpush.bf16.msra.mxu3 %v670_v11 }
  0x24   : > { %386 = vmatpush.bf16.msra.mxu0 %v661_v12  ;;  %682 = vmatpush.bf16.msra.mxu2 %v661_v12 }
  0x25   : > { %415 = vmatpush.bf16.msra.mxu1 %v669_v13  ;;  %690 = vmatpush.bf16.msra.mxu3 %v669_v13 }
  0x28   : > { %387 = vmatpush.bf16.msra.mxu0 %v660_v14  ;;  %683 = vmatpush.bf16.msra.mxu2 %v660_v14 }
  0x29   : > { %416 = vmatpush.bf16.msra.mxu1 %v668_v15  ;;  %691 = vmatpush.bf16.msra.mxu3 %v668_v15 }
  0x2b   : > { %388 = vmatmul.bf16.vlgmr.msra.gmra.mxu0 %v556_v24  ;;  %398 = vmatmul.bf16.vlgmr.msra.gmra.mxu2 %v572_v25 }
  0x2c   : > { %417 = vmatmul.bf16.vlgmr.msra.gmra.mxu1 %v560_v26  ;;  %427 = vmatmul.bf16.vlgmr.msra.gmra.mxu3 %v576_v27 }
  0x3b   : > { %393 = vmatmul.bf16.gmra.mxu0 %v564_v36  ;;  %403 = vmatmul.bf16.gmra.mxu2 %v580_v37 }
  0x3c   : > { %422 = vmatmul.bf16.gmra.mxu1 %v568_v38  ;;  %432 = vmatmul.bf16.gmra.mxu3 %v584_v39 }
  0xa8   : > { %v389_v40 = vpop.f32.mrf.mxu0 }
  0xa9   : > { %v418_v42 = vpop.f32.mrf.mxu1 }
  0xaa   : > { %v419_v43 = vadd.f32 %v418_v42, %v389_v40 }
  0xac   : > { %v442_v45 = vmul.f32 %v700_v41, %v419_v43 }
  0xae   : > { %v454_v46 = vadd.f32 %v701_v44, %v442_v45  ;;  %v399_v47 = vpop.f32.mrf.mxu2 }
  0xaf   : > { %v428_v48 = vpop.f32.mrf.mxu3 }
  0xb0   : > { %v462_v49 = vmax.f32 %v454_v46, 0.0  ;;  %v429_v50 = vadd.f32 %v428_v48, %v399_v47  ;;  %v391_v51 = vpop.f32.mrf.mxu0 }
  0xb1   : > { %v420_v52 = vpop.f32.mrf.mxu1 }
  0xb2   : > { %v470_v53 = vpack.c.bf16 %v462_v49, %v462_v49  ;;  %v446_v54 = vmul.f32 %v700_v41, %v429_v50  ;;  %v421_v55 = vadd.f32 %v420_v52, %v391_v51 }
  0xb4   : > { %479 = vst.msk [vmem:[%s825_s11] sm:$0xf] %vm478_vm0, %v470_v53  ;;  %v458_v56 = vadd.f32 %v701_v44, %v446_v54  ;;  %v443_v57 = vmul.f32 %v700_v41, %v421_v55 }
  0xb6   : > { %v466_v58 = vmax.f32 %v458_v56, 0.0  ;;  %v455_v59 = vadd.f32 %v701_v44, %v443_v57  ;;  %v401_v60 = vpop.f32.mrf.mxu2 }
  0xb7   : > { %v430_v61 = vpop.f32.mrf.mxu3 }
  0xb8   : > { %v474_v62 = vpack.c.bf16 %v466_v58, %v466_v58  ;;  %v463_v63 = vmax.f32 %v455_v59, 0.0  ;;  %v431_v0 = vadd.f32 %v430_v61, %v401_v60  ;;  %v394_v1 = vpop.f32.mrf.mxu0 }
  0xb9   : > { %v423_v2 = vpop.f32.mrf.mxu1 }
  0xba   : > { %483 = vst.msk [vmem:[%s825_s11 + $0x10] sm:$0xf] %vm478_vm0, %v474_v62  ;;  %v471_v3 = vpack.c.bf16 %v463_v63, %v463_v63  ;;  %v447_v4 = vmul.f32 %v700_v41, %v431_v0  ;;  %v424_v5 = vadd.f32 %v423_v2, %v394_v1 }
  0xbc   : > { %480 = vst.msk [vmem:[%s825_s11 + $0x4] sm:$0xf] %vm478_vm0, %v471_v3  ;;  %v459_v6 = vadd.f32 %v701_v44, %v447_v4  ;;  %v444_v7 = vmul.f32 %v700_v41, %v424_v5 }
  0xbe   : > { %v467_v8 = vmax.f32 %v459_v6, 0.0  ;;  %v456_v9 = vadd.f32 %v701_v44, %v444_v7  ;;  %v404_v10 = vpop.f32.mrf.mxu2 }
  0xbf   : > { %v433_v11 = vpop.f32.mrf.mxu3 }
  0xc0   : > { %v475_v12 = vpack.c.bf16 %v467_v8, %v467_v8  ;;  %v464_v13 = vmax.f32 %v456_v9, 0.0  ;;  %v434_v14 = vadd.f32 %v433_v11, %v404_v10  ;;  %v396_v15 = vpop.f32.mrf.mxu0 }
  0xc1   : > { %v425_v16 = vpop.f32.mrf.mxu1 }
  0xc2   : > { %484 = vst.msk [vmem:[%s825_s11 + $0x14] sm:$0xf] %vm478_vm0, %v475_v12  ;;  %v472_v17 = vpack.c.bf16 %v464_v13, %v464_v13  ;;  %v448_v18 = vmul.f32 %v700_v41, %v434_v14  ;;  %v426_v19 = vadd.f32 %v425_v16, %v396_v15 }
  0xc4   : > { %481 = vst.msk [vmem:[%s825_s11 + $0x8] sm:$0xf] %vm478_vm0, %v472_v17  ;;  %v460_v20 = vadd.f32 %v701_v44, %v448_v18  ;;  %v445_v21 = vmul.f32 %v700_v41, %v426_v19 }
  0xc6   : > { %v468_v22 = vmax.f32 %v460_v20, 0.0  ;;  %v457_v23 = vadd.f32 %v701_v44, %v445_v21  ;;  %v406_v24 = vpop.f32.mrf.mxu2 }
  0xc7   : > { %v435_v25 = vpop.f32.mrf.mxu3 }
  0xc8   : > { %v476_v26 = vpack.c.bf16 %v468_v22, %v468_v22  ;;  %v465_v27 = vmax.f32 %v457_v23, 0.0  ;;  %v436_v28 = vadd.f32 %v435_v25, %v406_v24 }
  0xca   : > { %485 = vst.msk [vmem:[%s825_s11 + $0x18] sm:$0xf] %vm478_vm0, %v476_v26  ;;  %v473_v29 = vpack.c.bf16 %v465_v27, %v465_v27  ;;  %v449_v30 = vmul.f32 %v700_v41, %v436_v28 }
  0xcc   : > { %482 = vst.msk [vmem:[%s825_s11 + $0xc] sm:$0xf] %vm478_vm0, %v473_v29  ;;  %v461_v31 = vadd.f32 %v701_v44, %v449_v30 }
  0xce   : > { %v469_v32 = vmax.f32 %v461_v31, 0.0 }
  0xd0   : > { %v477_v33 = vpack.c.bf16 %v469_v32, %v469_v32 }
  0xd2   : > { %486 = vst.msk [vmem:[%s825_s11 + $0x1c] sm:$0xf] %vm478_vm0, %v477_v33 }
  0xd3 PF: > { %s14_s15 = sadd.s32 1, %s708_s15  }
  0xd4   : > { %p11_p4 = scmp.ge.s32.totalorder %s14_s15, 4  }
  0xd6   :  { %13 = sbr.rel (!%p11_p4) target bundleno = 1 (0x1), region = 66 }

// kernel: net_single_layer_forward.3
= control target key start
LH: loop header
LB: loop body
LE: loop exit
PB: predicated region body
PF: predicated region fallthrough
CT: control target
= control target key end

     0   :  { %s2831_s30 = smov 0   ;;  %s3587_s0 = inlined_call_operand.vmem [shape: bf16[2,4,48,64], index: 0, kind: input, shape index: {}]   ;;  %s3588_s1 = inlined_call_operand.vmem [shape: bf16[9,64,64], index: 1, kind: input, shape index: {}]   ;;  %s3589_s2 = inlined_call_operand.vmem [shape: f32[1,64], index: 2, kind: input, shape index: {}]   ;;  %s3590_s3 = inlined_call_operand.vmem [shape: f32[1,64], index: 3, kind: input, shape index: {}]   ;;  %s3591_s4 = inlined_call_operand.vmem [shape: bf16[9,64,64], index: 4, kind: input, shape index: {}]   ;;  %s3592_s5 = inlined_call_operand.vmem [shape: f32[1,64], index: 5, kind: input, shape index: {}]   ;;  %s3593_s6 = inlined_call_operand.vmem [shape: f32[1,64], index: 6, kind: input, shape index: {}]   ;;  %s3594_s7 = inlined_call_operand.vmem [shape: f32[64,1024], index: 7, kind: input, shape index: {}]   ;;  %s3595_s8 = inlined_call_operand.vmem [shape: f32[1,1024], index: 8, kind: input, shape index: {}]   ;;  %s3596_s9 = inlined_call_operand.vmem [shape: f32[2,1,1024], index: 9, kind: output, shape index: {}]  }
   0x1 LB: > { %s2157_s10 = sadd.s32 4294967295, %s2777_s30   ;;  %p2161_p0 = scmp.ge.s32.totalorder %s2777_s30, 1  ;;  %s2777_s30 = sphi %s2831_s30, %s19_s30  }
   0x2   : > { %p287_p1 = scmp.lt.s32.totalorder %s2777_s30, 3 }
   0x4   : > { %p288_p2 = pnand %p2161_p0, %p287_p1 }
   0x5   : > { %p322_p3 = scmp.lt.s32.totalorder (!%p288_p2), %s2157_s10, 1 }
   0x6   : > { %291 = sbr.rel (%p288_p2) target bundleno = 637 (0x27d), region = 56 }
   0xb   : > { %v2647_v0 = vld [vmem:[%s3588_s1 + $0x38] sm:$0xff]  ;;  %v2646_v4 = vld [vmem:[%s3588_s1 + $0x30] sm:$0xff]  ;;  %s3606_s10 = smov (!%p322_p3, %s2157_s10), 1  ;;  %v448_v6 = vlaneseq  ;;  %v2645_v9 = vld [vmem:[%s3588_s1 + $0x28] sm:$0xff]  ;;  %vm380_vm0 = vcmask 1046528   ;;  %vm555_vm4 = vcmask 523264  }
   0xc   : > { %v2643_v1 = vld [vmem:[%s3588_s1 + $0x18] sm:$0xff]  ;;  %566 = vmatpush.bf16.msra.mxu0 %v2647_v0  ;;  %v2642_v5 = vld [vmem:[%s3588_s1 + $0x10] sm:$0xff]  ;;  %s2756_s27 = smul.u32 96, %s3606_s10  ;;  %v2641_v11 = vld [vmem:[%s3588_s1 + $0x8] sm:$0xff]  ;;  %vm581_vm6 = vsmask.f32 4352 }
   0xd   : > { %v2651_v2 = vld [vmem:[%s3588_s1 + $0x58] sm:$0xff]  ;;  %642 = vmatpush.bf16.msra.mxu1 %v2643_v1  ;;  %v2650_v7 = vld [vmem:[%s3588_s1 + $0x50] sm:$0xff]  ;;  %v2874_v10 = vshrl.u32 %v448_v6, 7  ;;  %v2649_v12 = vld [vmem:[%s3588_s1 + $0x48] sm:$0xff]  ;;  %vm667_vm7 = vsmask.f32 7424 }
   0xe   : > { %v2655_v3 = vld [vmem:[%s3588_s1 + $0x78] sm:$0xff]  ;;  %720 = vmatpush.bf16.msra.mxu2 %v2651_v2  ;;  %v2654_v8 = vld [vmem:[%s3588_s1 + $0x70] sm:$0xff]  ;;  %s2872_s13 = scalar_lea.vmem %s3587_s0, %s2756_s27  ;;  %v2653_v13 = vld [vmem:[%s3588_s1 + $0x68] sm:$0xff]  ;;  %vm2094_vm8 = vcmask 1044484   ;;  %vm2090_vm9 = vcmask 1042434   ;;  %vm2088_vm10 = vcmask 1040384  }
   0xf   : > { %795 = vmatpush.bf16.msra.mxu3 %v2655_v3  ;;  %v2713_v14 = vld [vmem:[%s2872_s13] sm:$0xff]   ;;  %v2748_v15 = vld [vmem:[%s2872_s13 + $0x8] sm:$0xff]   ;;  %v2749_v16 = vld [vmem:[%s2872_s13 + $0x10] sm:$0xff]   ;;  %v2909_v29 = vadd.s32 8, %v2874_v10  ;;  %v2912_v30 = vadd.s32 16, %v2874_v10  ;;  %v2920_v34 = vadd.s32 24, %v2874_v10 }
  0x10   : > { %567 = vmatpush.bf16.msra.mxu0 %v2646_v4  ;;  %v2644_v17 = vld [vmem:[%s3588_s1 + $0x20] sm:$0xff]  ;;  %v2714_v18 = vunpack.c.l.bf16 %v2713_v14  ;;  %v2891_v19 = vunpack.c.h.bf16 %v2713_v14  ;;  %v2718_v20 = vunpack.c.l.bf16 %v2748_v15  ;;  %v2719_v21 = vunpack.c.h.bf16 %v2748_v15  ;;  %v2894_v22 = vld [vmem:[%s2872_s13 + $0x18] sm:$0xff]   ;;  %v2906_v28 = vld [vmem:[%s2872_s13 + $0x30] sm:$0xff]   ;;  %s2163_s12 = sshll.u32 %s3606_s10, 3 }
  0x11   : > { %643 = vmatpush.bf16.msra.mxu1 %v2642_v5  ;;  %v2659_v23 = vld [vmem:[%s3588_s1 + $0x98] sm:$0xff]  ;;  %v2640_v24 = vld [vmem:[%s3588_s1] sm:$0xff]  ;;  %v2722_v25 = vunpack.c.l.bf16 %v2749_v16  ;;  %v2723_v26 = vunpack.c.h.bf16 %v2749_v16  ;;  %v2726_v32 = vunpack.c.l.bf16 %v2894_v22  ;;  %v2727_v33 = vunpack.c.h.bf16 %v2894_v22  ;;  %v2658_v51 = vld [vmem:[%s3588_s1 + $0x90] sm:$0xff]  ;;  %s330_s16 = scalar_lea.vmem %s3596_s9, %s2163_s12 }
  0x12   : > { %721 = vmatpush.bf16.msra.mxu2 %v2650_v7  ;;  %v2903_v27 = vld [vmem:[%s2872_s13 + $0x20] sm:$0xff]   ;;  %v457_v35 = vand.u32 7, %v2874_v10  ;;  %v381_v37 = vrot.slane %v2714_v18, 1  ;;  %v382_v38 = vrot.slane %v2891_v19, 1  ;;  %v384_v39 = vrot.slane %v2718_v20, 1  ;;  %v2930_v43 = vld [vmem:[%s2872_s13 + $0x38] sm:$0xff]  }
  0x13   : > { %796 = vmatpush.bf16.msra.mxu3 %v2654_v8  ;;  %v2648_v31 = vld [vmem:[%s3588_s1 + $0x40] sm:$0xff]  ;;  %v386_v40 = vrot.slane %v2719_v21, 1  ;;  %v2730_v41 = vunpack.c.l.bf16 %v2903_v27  ;;  %v2734_v42 = vunpack.c.l.bf16 %v2906_v28  ;;  %v388_v45 = vrot.slane %v2722_v25, 1  ;;  %v2168_v52 = vld [vmem:[%s2872_s13 + $0x28] sm:$0xf]  ;;  %v2667_v6 = vld [vmem:[%s3588_s1 + $0xd8] sm:$0xff] }
  0x14   : > { %568 = vmatpush.bf16.msra.mxu0 %v2645_v9  ;;  %v2652_v36 = vld [vmem:[%s3588_s1 + $0x60] sm:$0xff]  ;;  %v403_v46 = vrot.slane %v2723_v26, 1  ;;  %v2735_v47 = vunpack.c.h.bf16 %v2906_v28  ;;  %v383_v48 = vsel %vm380_vm0, %v381_v37, %v382_v38  ;;  %v385_v49 = vsel %vm380_vm0, %v382_v38, %v384_v39  ;;  %v2657_v5 = vld [vmem:[%s3588_s1 + $0x88] sm:$0xff]  ;;  %v2662_v28 = vld [vmem:[%s3588_s1 + $0xb0] sm:$0xff] }
  0x15   : > { %644 = vmatpush.bf16.msra.mxu1 %v2641_v11  ;;  %v2173_v44 = vld [vmem:[%s2872_s13 + $0x40] sm:$0xf]  ;;  %v387_v50 = vsel %vm380_vm0, %v384_v39, %v386_v40  ;;  %v389_v53 = vsel %vm380_vm0, %v386_v40, %v388_v45  ;;  %v394_v54 = vmax.f32 %v2714_v18, %v383_v48  ;;  %v395_v55 = vmax.f32 %v2891_v19, %v385_v49  ;;  %v2754_v7 = vld [vmem:[%s2872_s13 + $0x48] sm:$0xff]   ;;  %v2663_v40 = vld [vmem:[%s3588_s1 + $0xb8] sm:$0xff] }
  0x16   : > { %722 = vmatpush.bf16.msra.mxu2 %v2649_v12  ;;  %v396_v56 = vmax.f32 %v2718_v20, %v387_v50  ;;  %v2738_v57 = vunpack.c.l.bf16 %v2930_v43  ;;  %v2739_v58 = vunpack.c.h.bf16 %v2930_v43  ;;  %v365_v59 = vunpack.c.l.bf16 %v2173_v44 }
  0x17   : > { %797 = vmatpush.bf16.msra.mxu3 %v2653_v13  ;;  %v397_v60 = vmax.f32 %v2719_v21, %v389_v53  ;;  %v398_v61 = vmax.f32 %v394_v54, %v2891_v19  ;;  %v399_v62 = vmax.f32 %v395_v55, %v2718_v20  ;;  %v404_v0 = vsel %vm380_vm0, %v388_v45, %v403_v46  ;;  %v2755_v13 = vld [vmem:[%s2872_s13 + $0x50] sm:$0xff]  }
  0x18   : > { %569 = vmatpush.bf16.msra.mxu0 %v2644_v17  ;;  %v400_v63 = vmax.f32 %v396_v56, %v2719_v21  ;;  %v2731_v1 = vunpack.c.h.bf16 %v2903_v27  ;;  %v354_v2 = vunpack.c.l.bf16 %v2168_v52  ;;  %v464_v4 = vand.u32 7, %v2909_v29 }
  0x19   : > { %645 = vmatpush.bf16.msra.mxu1 %v2640_v24  ;;  %v401_v3 = vmax.f32 %v397_v60, %v2722_v25  ;;  %v406_v8 = vmax.f32 %v398_v61, %v385_v49  ;;  %v407_v9 = vmax.f32 %v399_v62, %v387_v50  ;;  %v427_v12 = vrot.slane %v2734_v42, 1 }
  0x1a   : > { %723 = vmatpush.bf16.msra.mxu2 %v2648_v31  ;;  %v408_v11 = vmax.f32 %v400_v63, %v389_v53  ;;  %v428_v15 = vrot.slane %v2735_v47, 1  ;;  %v430_v16 = vrot.slane %v2738_v57, 1  ;;  %v432_v17 = vrot.slane %v2739_v58, 1  ;;  %v1882_v63 = vld [vmem:[%s3594_s7 + $0x1b0] sm:$0xff] }
  0x1b   : > { %798 = vmatpush.bf16.msra.mxu3 %v2652_v36  ;;  %v409_v14 = vmax.f32 %v401_v3, %v404_v0  ;;  %v410_v18 = vmax.f32 %v406_v8, %v2726_v32  ;;  %v411_v19 = vmax.f32 %v407_v9, %v2727_v33  ;;  %v434_v21 = vrot.slane %v365_v59, 1 }
  0x1c   : > { %857 = vmatpush.bf16.msrb.mxu0 %v2659_v23  ;;  %v412_v20 = vmax.f32 %v408_v11, %v2730_v41  ;;  %v2742_v23 = vunpack.c.l.bf16 %v2754_v7  ;;  %v2743_v24 = vunpack.c.h.bf16 %v2754_v7  ;;  %v471_v26 = vand.u32 7, %v2912_v30  ;;  %v2675_v11 = vld [vmem:[%s3588_s1 + $0x118] sm:$0xff] }
  0x1d   : > { %v413_v25 = vmax.f32 %v409_v14, %v2731_v1  ;;  %v2746_v27 = vunpack.c.l.bf16 %v2755_v13  ;;  %v414_v29 = vmax.f32 %v410_v18, %v2727_v33  ;;  %v415_v31 = vmax.f32 %v411_v19, %v2730_v41  ;;  %v2656_v33 = vld [vmem:[%s3588_s1 + $0x80] sm:$0xff]  ;;  %v2671_v41 = vld [vmem:[%s3588_s1 + $0xf8] sm:$0xff]  ;;  %930 = vmatpush.bf16.msrb.mxu1 %v2663_v40 }
  0x1e   : > { %997 = vmatpush.bf16.msrb.mxu2 %v2667_v6  ;;  %v416_v36 = vmax.f32 %v412_v20, %v2731_v1  ;;  %v429_v32 = vsel %vm380_vm0, %v427_v12, %v428_v15  ;;  %v431_v38 = vsel %vm380_vm0, %v428_v15, %v430_v16  ;;  %v433_v39 = vsel %vm380_vm0, %v430_v16, %v432_v17  ;;  %v2669_v12 = vld [vmem:[%s3588_s1 + $0xe8] sm:$0xff]  ;;  %v2664_v18 = vld [vmem:[%s3588_s1 + $0xc0] sm:$0xff] }
  0x1f   : > { %v417_v37 = vmax.f32 %v413_v25, %v354_v2  ;;  %v418_v30 = vmax.f32 %v414_v29, %v2734_v42  ;;  %v419_v43 = vmax.f32 %v415_v31, %v2735_v47  ;;  %v435_v22 = vsel %vm380_vm0, %v432_v17, %v434_v21  ;;  %v2666_v42 = vld [vmem:[%s3588_s1 + $0xd0] sm:$0xff]  ;;  %1057 = vmatpush.bf16.msrb.mxu3 %v2671_v41  ;;  %v2660_v17 = vld [vmem:[%s3588_s1 + $0xa0] sm:$0xff] }
  0x20   : > { %858 = vmatpush.bf16.msrb.mxu0 %v2658_v51  ;;  %v420_v44 = vmax.f32 %v416_v36, %v2738_v57  ;;  %v478_v46 = vand.u32 7, %v2920_v34  ;;  %v2747_v47 = vunpack.c.h.bf16 %v2755_v13  ;;  %v2670_v51 = vld [vmem:[%s3588_s1 + $0xf0] sm:$0xff]  ;;  %vm2991_vm1 = vcmp.lt.s32.totalorder %v457_v35, 4 }
  0x21   : > { %v421_v45 = vmax.f32 %v417_v37, %v2739_v58  ;;  %v440_v48 = vmax.f32 %v418_v30, %v429_v32  ;;  %v441_v49 = vmax.f32 %v419_v43, %v431_v38  ;;  %vm2995_vm2 = vcmp.lt.s32.totalorder %v464_v4, 4  ;;  %931 = vmatpush.bf16.msrb.mxu1 %v2662_v28  ;;  %v2661_v4 = vld [vmem:[%s3588_s1 + $0xa8] sm:$0xff] }
  0x22   : > { %v442_v50 = vmax.f32 %v420_v44, %v433_v39  ;;  %vm2999_vm3 = vcmp.lt.s32.totalorder %v471_v26, 4  ;;  %998 = vmatpush.bf16.msrb.mxu2 %v2666_v42  ;;  %v2779_v58 = vmov 0   ;;  %vm3013_vm5 = vcmp.lt.s32.totalorder %v478_v46, 4  ;;  %v2674_v44 = vld [vmem:[%s3588_s1 + $0x110] sm:$0xff] }
  0x23   : > { %v443_v34 = vmax.f32 %v421_v45, %v435_v22  ;;  %v444_v55 = vmax.f32 %v440_v48, %v2742_v23  ;;  %v445_v56 = vmax.f32 %v441_v49, %v2743_v24  ;;  %v585_v10 = vrot.slane %v2779_v58, 3  ;;  %1058 = vmatpush.bf16.msrb.mxu3 %v2670_v51  ;;  %v2668_v24 = vld [vmem:[%s3588_s1 + $0xe0] sm:$0xff]  ;;  %v2673_v51 = vld [vmem:[%s3588_s1 + $0x108] sm:$0xff] }
  0x24   : > { %859 = vmatpush.bf16.msrb.mxu0 %v2657_v5  ;;  %v446_v57 = vmax.f32 %v442_v50, %v2746_v27  ;;  %v588_v35 = vrot.slane %v2779_v58, 4  ;;  %v2780_v1 = vmov 0.0   ;;  %v2665_v5 = vld [vmem:[%s3588_s1 + $0xc8] sm:$0xff]  ;;  %vm2092_vm11 = vcmask 1041408  }
  0x25   : > { %v447_v59 = vmax.f32 %v443_v34, %v2747_v47  ;;  %v505_v60 = vsel %vm2991_vm1, %v444_v55, 0.0  ;;  %v506_v61 = vsel %vm2995_vm2, %v445_v56, 0.0  ;;  %932 = vmatpush.bf16.msrb.mxu1 %v2661_v4  ;;  %vm2096_vm12 = vcmask 1046534  }
  0x26   : > { %v3011_v62 = vsel %vm2999_vm3, %v446_v57, 0.0  ;;  %v3017_v0 = vpack.c.bf16 %v506_v61, %v505_v60  ;;  %v520_v2 = vpack.c.bf16 %v505_v60, %v2780_v1  ;;  %v3042_v14 = vor.u32 %v588_v35, %v585_v10  ;;  %999 = vmatpush.bf16.msrb.mxu2 %v2665_v5  ;;  %v2672_v35 = vld [vmem:[%s3588_s1 + $0x100] sm:$0xff] }
  0x27   : > { %v3021_v3 = vpack.c.bf16 %v3011_v62, %v506_v61  ;;  %v3040_v13 = vsel %vm3013_vm5, %v447_v59, 0.0  ;;  %1059 = vmatpush.bf16.msrb.mxu3 %v2669_v12  ;;  %v511_v37 = vpack.c.bf16 %v3011_v62, %v3011_v62  ;;  %v3103_v12 = vrot.slane %v2779_v58, 1 }
  0x28   : > { %860 = vmatpush.bf16.msrb.mxu0 %v2656_v33  ;;  %v670_v6 = vshll.u32 %v520_v2, 16  ;;  %v591_v7 = vshrl.u32 %v3017_v0, 16  ;;  %v594_v8 = vshll.u32 %v3017_v0, 16  ;;  %v668_v9 = vshrl.u32 %v520_v2, 16 }
  0x29   : > { %2202 = vmatmul.msk.bf16.vlgmr.msra.gmra.mxu0 %vm555_vm4, %v520_v2  ;;  %v674_v15 = vshll.u32 %v3021_v3, 16  ;;  %v678_v16 = vshrl.u32 %v3021_v3, 16  ;;  %933 = vmatpush.bf16.msrb.mxu1 %v2660_v17  ;;  %v657_v39 = vpack.c.bf16 %v3040_v13, %v3040_v13  ;;  %v600_v22 = vshrl.u32 %v511_v37, 16 }
  0x2a   : > { %v593_v19 = vrot.slane %v591_v7, 3  ;;  %v596_v20 = vrot.slane %v594_v8, 4  ;;  %v672_v21 = vrot.slane %v670_v6, 1  ;;  %v748_v23 = vrot.slane %v668_v9, 3  ;;  %1000 = vmatpush.bf16.msrb.mxu2 %v2664_v18 }
  0x2b   : > { %v676_v25 = vrot.slane %v674_v15, 1  ;;  %v749_v26 = vrot.slane %v670_v6, 4  ;;  %v751_v27 = vrot.slane %v678_v16, 3  ;;  %v752_v29 = vrot.slane %v674_v15, 4  ;;  %1060 = vmatpush.bf16.msrb.mxu3 %v2668_v24 }
  0x2c   : > { %1127 = vmatpush.bf16.msra.mxu0 %v2675_v11  ;;  %v597_v31 = vor.u32 %v596_v20, %v593_v19  ;;  %v673_v36 = vor.u32 %v672_v21, %v668_v9  ;;  %v603_v33 = vshll.u32 %v511_v37, 16  ;;  %v682_v41 = vshll.u32 %v657_v39, 16 }
  0x2d   : > { %v750_v32 = vor.u32 %v749_v26, %v748_v23  ;;  %v753_v38 = vor.u32 %v752_v29, %v751_v27  ;;  %v755_v45 = vshrl.u32 %v657_v39, 16  ;;  %v602_v46 = vrot.slane %v600_v22, 3  ;;  %v2683_v23 = vld [vmem:[%s3591_s4 + $0x38] sm:$0xff]  ;;  %v2682_v27 = vld [vmem:[%s3591_s4 + $0x30] sm:$0xff] }
  0x2e   : > { %v598_v40 = vsel %vm581_vm6, %v3042_v14, %v597_v31  ;;  %v677_v30 = vsel %vm667_vm7, %v673_v36, %v676_v25  ;;  %v605_v28 = vrot.slane %v603_v33, 4  ;;  %v758_v47 = vrot.slane %v682_v41, 4 }
  0x2f   : > { %2220 = vmatmul.msk.bf16.vlgmr.msra.gmra.mxu1 %vm555_vm4, %v598_v40  ;;  %2246 = vmatmul.msk.bf16.vlgmr.msra.gmra.mxu2 %vm555_vm4, %v677_v30  ;;  %v754_v43 = vsel %vm581_vm6, %v750_v32, %v753_v38  ;;  %v757_v42 = vrot.slane %v755_v45, 3  ;;  %v680_v49 = vor.u32 %v678_v16, %v676_v25  ;;  %v684_v50 = vrot.slane %v682_v41, 1  ;;  %v2681_v32 = vld [vmem:[%s3591_s4 + $0x28] sm:$0xff]  ;;  %v2679_v41 = vld [vmem:[%s3591_s4 + $0x18] sm:$0xff] }
  0x30   : > { %2272 = vmatmul.msk.bf16.vlgmr.msra.gmra.mxu3 %vm555_vm4, %v754_v43  ;;  %1128 = vmatpush.bf16.msra.mxu0 %v2674_v44  ;;  %v606_v48 = vor.u32 %v605_v28, %v602_v46  ;;  %v814_v55 = vpack.c.bf16 %v3040_v13, %v3011_v62  ;;  %v885_v61 = vrot.slane %v594_v8, 1  ;;  %v2680_v44 = vld [vmem:[%s3591_s4 + $0x20] sm:$0xff]  ;;  %v2687_v46 = vld [vmem:[%s3591_s4 + $0x58] sm:$0xff]  ;;  %v2678_v28 = vld [vmem:[%s3591_s4 + $0x10] sm:$0xff]  ;;  %vm2098_vm13 = vcmask 1045508  }
  0x31   : > { %v759_v34 = vor.u32 %v758_v47, %v757_v42  ;;  %v685_v57 = vsel %vm667_vm7, %v680_v49, %v684_v50  ;;  %1225 = vmatpush.bf16.msra.mxu1 %v2683_v23  ;;  %1292 = vmatpush.bf16.msra.mxu2 %v2679_v41  ;;  %vm2100_vm14 = vcmask 1043456  }
  0x32   : > { %v607_v56 = vsel %vm581_vm6, %v597_v31, %v606_v48  ;;  %v887_v59 = vshll.u32 %v814_v55, 16  ;;  %v891_v60 = vshrl.u32 %v814_v55, 16  ;;  %v886_v4 = vor.u32 %v885_v61, %v591_v7  ;;  %1369 = vmatpush.bf16.msra.mxu3 %v2687_v46 }
  0x33   : > { %v760_v10 = vsel %vm581_vm6, %v753_v38, %v759_v34  ;;  %v2677_v34 = vld [vmem:[%s3591_s4 + $0x8] sm:$0xff] }
  0x34   : > { %1129 = vmatpush.bf16.msra.mxu0 %v2673_v51  ;;  %v958_v62 = vrot.slane %v891_v60, 3  ;;  %v959_v2 = vrot.slane %v887_v59, 4  ;;  %v889_v5 = vrot.slane %v887_v59, 1  ;;  %v2691_v51 = vld [vmem:[%s3591_s4 + $0x78] sm:$0xff]  ;;  %v2676_v59 = vld [vmem:[%s3591_s4] sm:$0xff] }
  0x35   : > { %1226 = vmatpush.bf16.msra.mxu1 %v2682_v27  ;;  %1293 = vmatpush.bf16.msra.mxu2 %v2678_v28  ;;  %v2693_v27 = vld [vmem:[%s3591_s4 + $0x88] sm:$0xff] }
  0x36   : > { %v960_v6 = vor.u32 %v959_v2, %v958_v62  ;;  %v890_v9 = vsel %vm667_vm7, %v886_v4, %v889_v5  ;;  %v893_v8 = vor.u32 %v891_v60, %v889_v5  ;;  %v2685_v2 = vld [vmem:[%s3591_s4 + $0x48] sm:$0xff] }
  0x38   : > { %1130 = vmatpush.bf16.msra.mxu0 %v2672_v35  ;;  %v961_v11 = vsel %vm581_vm6, %v597_v31, %v960_v6  ;;  %v895_v7 = vsel %vm667_vm7, %v893_v8, %v3103_v12  ;;  %v962_v15 = vsel %vm581_vm6, %v960_v6, %v3042_v14  ;;  %v2690_v35 = vld [vmem:[%s3591_s4 + $0x70] sm:$0xff] }
  0x39   : > { %2203 = vmatmul.msk.bf16.gmra.mxu0 %vm555_vm4, %v3021_v3  ;;  %1227 = vmatpush.bf16.msra.mxu1 %v2681_v32 }
  0x3a   : > { %1294 = vmatpush.bf16.msra.mxu2 %v2677_v34 }
  0x3d   : > { %1228 = vmatpush.bf16.msra.mxu1 %v2680_v44 }
  0x3e   : > { %1295 = vmatpush.bf16.msra.mxu2 %v2676_v59 }
  0x3f   : > { %2221 = vmatmul.msk.bf16.gmra.mxu1 %vm555_vm4, %v607_v56  ;;  %2247 = vmatmul.msk.bf16.gmra.mxu2 %vm555_vm4, %v685_v57  ;;  %v2695_v56 = vld [vmem:[%s3591_s4 + $0x98] sm:$0xff] }
  0x40   : > { %2273 = vmatmul.msk.bf16.gmra.mxu3 %vm555_vm4, %v760_v10 }
  0x49   : > { %2298 = vmatmul.msk.bf16.vlgmr.msrb.gmra.mxu0 %vm555_vm4, %v3017_v0  ;;  %v1016_v0 = vpack.c.bf16 0.0, %v3040_v13 }
  0x4a   : > { %1444 = vmatpush.bf16.msrb.mxu0 %v2691_v51 }
  0x4b   : > { %v1085_v16 = vshll.u32 %v1016_v0, 16  ;;  %v1089_v58 = vshrl.u32 %v1016_v0, 16 }
  0x4e   : > { %1445 = vmatpush.bf16.msrb.mxu0 %v2690_v35 }
  0x4f   : > { %2324 = vmatmul.msk.bf16.vlgmr.msrb.gmra.mxu1 %vm555_vm4, %v890_v9  ;;  %2350 = vmatmul.msk.bf16.vlgmr.msrb.gmra.mxu2 %vm555_vm4, %v961_v11  ;;  %v2694_v9 = vld [vmem:[%s3591_s4 + $0x90] sm:$0xff]  ;;  %v2689_v11 = vld [vmem:[%s3591_s4 + $0x68] sm:$0xff] }
  0x50   : > { %2376 = vmatmul.msk.bf16.vlgmr.msrb.gmra.mxu3 %vm555_vm4, %v3021_v3  ;;  %v1087_v3 = vrot.slane %v1085_v16, 1  ;;  %1506 = vmatpush.bf16.msrb.mxu1 %v2695_v56  ;;  %v2688_v16 = vld [vmem:[%s3591_s4 + $0x60] sm:$0xff] }
  0x52   : > { %v1088_v17 = vsel %vm667_vm7, %v680_v49, %v1087_v3  ;;  %v1091_v13 = vor.u32 %v1089_v58, %v1087_v3  ;;  %1446 = vmatpush.bf16.msrb.mxu0 %v2689_v11 }
  0x54   : > { %v1092_v18 = vsel %vm667_vm7, %v1091_v13, %v3103_v12  ;;  %1507 = vmatpush.bf16.msrb.mxu1 %v2694_v9  ;;  %v3189_v13 = vld [vmem:[%s3589_s2] ss:$0 sm:$0xff]  ;;  %v2706_v9 = vld [vmem:[%s3591_s4 + $0xf0] sm:$0xff] }
  0x56   : > { %1447 = vmatpush.bf16.msrb.mxu0 %v2688_v16 }
  0x58   : > { %1508 = vmatpush.bf16.msrb.mxu1 %v2693_v27 }
  0x59   : > { %2299 = vmatmul.msk.bf16.gmra.mxu0 %vm555_vm4, %v814_v55  ;;  %v2686_v55 = vld [vmem:[%s3591_s4 + $0x50] sm:$0xff] }
  0x5a   : > { %1370 = vmatpush.bf16.msra.mxu3 %v2686_v55 }
  0x5e   : > { %1371 = vmatpush.bf16.msra.mxu3 %v2685_v2 }
  0x5f   : > { %2325 = vmatmul.msk.bf16.gmra.mxu1 %vm555_vm4, %v895_v7  ;;  %2351 = vmatmul.msk.bf16.gmra.mxu2 %vm555_vm4, %v962_v15  ;;  %v2684_v7 = vld [vmem:[%s3591_s4 + $0x40] sm:$0xff] }
  0x60   : > { %2377 = vmatmul.msk.bf16.gmra.mxu3 %vm555_vm4, %v1016_v0 }
  0x62   : > { %1372 = vmatpush.bf16.msra.mxu3 %v2684_v7  ;;  %v2696_v7 = vld [vmem:[%s3591_s4 + $0xa0] sm:$0xff] }
  0x69   : > { %2402 = vmatmul.msk.bf16.vlgmr.msra.gmra.mxu0 %vm555_vm4, %v1088_v17 }
  0x79   : > { %2403 = vmatmul.msk.bf16.gmra.mxu0 %vm555_vm4, %v1092_v18 }
  0xa6   : > { %v571_v19 = vpop.f32.mrf.mxu0 }
  0xac   : > { %v647_v20 = vpop.f32.mrf.mxu1 }
  0xad   : > { %v648_v42 = vadd.f32 %v647_v20, %v571_v19 }
  0xae   : > { %v573_v21 = vpop.f32.mrf.mxu0 }
  0xb2   : > { %v725_v24 = vpop.f32.mrf.mxu2 }
  0xb3   : > { %v800_v25 = vpop.f32.mrf.mxu3  ;;  %v735_v49 = vadd.f32 %v725_v24, %v648_v42  ;;  %v3194_v24 = vld [vmem:[%s3590_s3] ss:$0 sm:$0xff] }
  0xb4   : > { %v649_v29 = vpop.f32.mrf.mxu1 }
  0xb5   : > { %v810_v57 = vadd.f32 %v800_v25, %v735_v49  ;;  %v650_v60 = vadd.f32 %v649_v29, %v573_v21 }
  0xb6   : > { %v576_v26 = vpop.f32.mrf.mxu0 }
  0xba   : > { %v727_v31 = vpop.f32.mrf.mxu2 }
  0xbb   : > { %v802_v36 = vpop.f32.mrf.mxu3  ;;  %v736_v4 = vadd.f32 %v727_v31, %v650_v60  ;;  %v2699_v31 = vld [vmem:[%s3591_s4 + $0xb8] sm:$0xff] }
  0xbc   : > { %v652_v38 = vpop.f32.mrf.mxu1  ;;  %1578 = vmatpush.bf16.msrb.mxu2 %v2699_v31 }
  0xbd   : > { %v811_v15 = vadd.f32 %v802_v36, %v736_v4  ;;  %v653_v3 = vadd.f32 %v652_v38, %v576_v26  ;;  %v2703_v36 = vld [vmem:[%s3591_s4 + $0xd8] sm:$0xff] }
  0xbe   : > { %v3124_v37 = vpop.f32.mrf.mxu0  ;;  %1645 = vmatpush.bf16.msrb.mxu3 %v2703_v36 }
  0xc2   : > { %v730_v39 = vpop.f32.mrf.mxu2 }
  0xc3   : > { %v3129_v30 = vpop.f32.mrf.mxu3  ;;  %v737_v20 = vadd.f32 %v730_v39, %v653_v3  ;;  %v2692_v39 = vld [vmem:[%s3591_s4 + $0x80] sm:$0xff] }
  0xc4   : > { %v3131_v43 = vpop.f32.mrf.mxu1  ;;  %1509 = vmatpush.bf16.msrb.mxu1 %v2692_v39 }
  0xc5   : > { %v812_v32 = vadd.f32 %v3129_v30, %v737_v20  ;;  %v2702_v30 = vld [vmem:[%s3591_s4 + $0xd0] sm:$0xff]  ;;  %v655_v41 = vadd.f32 %v3131_v43, %v3124_v37 }
  0xc6   : > { %v862_v40 = vpop.f32.mrf.mxu0  ;;  %1646 = vmatpush.bf16.msrb.mxu3 %v2702_v30 }
  0xc7   : > { %v872_v61 = vadd.f32 %v862_v40, %v810_v57  ;;  %v2707_v40 = vld [vmem:[%s3591_s4 + $0xf8] sm:$0xff] }
  0xc8   : > { %1705 = vmatpush.bf16.msra.mxu0 %v2707_v40 }
  0xca   : > { %v3136_v22 = vpop.f32.mrf.mxu2 }
  0xcb   : > { %v3141_v45 = vpop.f32.mrf.mxu3  ;;  %v738_v49 = vadd.f32 %v3136_v22, %v655_v41  ;;  %v2711_v22 = vld [vmem:[%s3591_s4 + $0x118] sm:$0xff] }
  0xcc   : > { %v935_v47 = vpop.f32.mrf.mxu1  ;;  %1706 = vmatpush.bf16.msra.mxu0 %v2706_v9 }
  0xcd   : > { %v945_v5 = vadd.f32 %v935_v47, %v872_v61  ;;  %v813_v57 = vadd.f32 %v3141_v45, %v738_v49  ;;  %v2701_v45 = vld [vmem:[%s3591_s4 + $0xc8] sm:$0xff] }
  0xce   : > { %v864_v33 = vpop.f32.mrf.mxu0  ;;  %1647 = vmatpush.bf16.msrb.mxu3 %v2701_v45 }
  0xcf   : > { %v873_v17 = vadd.f32 %v864_v33, %v811_v15  ;;  %v2698_v33 = vld [vmem:[%s3591_s4 + $0xb0] sm:$0xff]  ;;  %v2700_v15 = vld [vmem:[%s3591_s4 + $0xc0] sm:$0xff] }
  0xd0   : > { %1579 = vmatpush.bf16.msrb.mxu2 %v2698_v33 }
  0xd2   : > { %v1002_v50 = vpop.f32.mrf.mxu2  ;;  %1648 = vmatpush.bf16.msrb.mxu3 %v2700_v15 }
  0xd3   : > { %v1062_v10 = vpop.f32.mrf.mxu3  ;;  %v1012_v8 = vadd.f32 %v1002_v50, %v945_v5 }
  0xd4   : > { %v937_v6 = vpop.f32.mrf.mxu1 }
  0xd5   : > { %v1072_v58 = vadd.f32 %v1062_v10, %v1012_v8  ;;  %v946_v21 = vadd.f32 %v937_v6, %v873_v17 }
  0xd6   : > { %v3149_v48 = vpop.f32.mrf.mxu0 }
  0xd7   : > { %v874_v46 = vadd.f32 %v3149_v48, %v812_v32  ;;  %v2697_v48 = vld [vmem:[%s3591_s4 + $0xa8] sm:$0xff] }
  0xd8   : > { %1580 = vmatpush.bf16.msrb.mxu2 %v2697_v48 }
  0xda   : > { %v1004_v0 = vpop.f32.mrf.mxu2 }
  0xdb   : > { %v1064_v18 = vpop.f32.mrf.mxu3  ;;  %v1013_v25 = vadd.f32 %v1004_v0, %v946_v21  ;;  %v2710_v0 = vld [vmem:[%s3591_s4 + $0x110] sm:$0xff] }
  0xdc   : > { %v940_v29 = vpop.f32.mrf.mxu1  ;;  %1581 = vmatpush.bf16.msrb.mxu2 %v2696_v7 }
  0xdd   : > { %v1073_v28 = vadd.f32 %v1064_v18, %v1013_v25  ;;  %v947_v50 = vadd.f32 %v940_v29, %v874_v46 }
  0xde   : > { %v3169_v62 = vpop.f32.mrf.mxu0 }
  0xdf   : > { %v875_v35 = vadd.f32 %v3169_v62, %v813_v57 }
  0xe2   : > { %v1007_v44 = vpop.f32.mrf.mxu2 }
  0xe3   : > { %v1067_v55 = vpop.f32.mrf.mxu3  ;;  %v1014_v37 = vadd.f32 %v1007_v44, %v947_v50 }
  0xe4   : > { %v942_v10 = vpop.f32.mrf.mxu1 }
  0xe5   : > { %v1074_v59 = vadd.f32 %v1067_v55, %v1014_v37  ;;  %v948_v4 = vadd.f32 %v942_v10, %v875_v35  ;;  %v2708_v35 = vld [vmem:[%s3591_s4 + $0x100] sm:$0xff] }
  0xe6   : > { %v1132_v19 = vpop.f32.mrf.mxu0 }
  0xe7   : > { %v1142_v23 = vadd.f32 %v1132_v19, %v1072_v58  ;;  %v2705_v58 = vld [vmem:[%s3591_s4 + $0xe8] sm:$0xff] }
  0xe8   : > { %1707 = vmatpush.bf16.msra.mxu0 %v2705_v58 }
  0xe9   : > { %v1150_v26 = vmul.f32 %v3189_v13, %v1142_v23 }
  0xea   : > { %v1009_v61 = vpop.f32.mrf.mxu2 }
  0xeb   : > { %v1158_v38 = vadd.f32 %v3194_v24, %v1150_v26  ;;  %v1015_v62 = vadd.f32 %v1009_v61, %v948_v4  ;;  %v1069_v16 = vpop.f32.mrf.mxu3 }
  0xed   : > { %v1162_v42 = vmax.f32 %v1158_v38, 0.0  ;;  %v1075_v23 = vadd.f32 %v1069_v16, %v1015_v62 }
  0xee   : > { %v1134_v47 = vpop.f32.mrf.mxu0 }
  0xef   : > { %v1166_v51 = vsel %vm2991_vm1, %v1162_v42, 0.0  ;;  %v1143_v34 = vadd.f32 %v1134_v47, %v1073_v28  ;;  %v2709_v28 = vld [vmem:[%s3591_s4 + $0x108] sm:$0xff]  ;;  %v2704_v42 = vld [vmem:[%s3591_s4 + $0xe0] sm:$0xff] }
  0xf0   : > { %v3227_v56 = vpack.c.bf16 %v1166_v51, %v2780_v1  ;;  %1708 = vmatpush.bf16.msra.mxu0 %v2704_v42 }
  0xf1   : > { %v1151_v43 = vmul.f32 %v3189_v13, %v1143_v34 }
  0xf2   : > { %2428 = vmatmul.msk.bf16.vlgmr.msra.gmra.mxu1 %vm555_vm4, %v3227_v56  ;;  %v1319_v18 = vshll.u32 %v3227_v56, 16  ;;  %v1317_v29 = vshrl.u32 %v3227_v56, 16 }
  0xf3   : > { %v1159_v1 = vadd.f32 %v3194_v24, %v1151_v43  ;;  %1775 = vmatpush.bf16.msra.mxu1 %v2711_v22 }
  0xf4   : > { %v1321_v32 = vrot.slane %v1319_v18, 1  ;;  %v1397_v41 = vrot.slane %v1317_v29, 3  ;;  %v1398_v46 = vrot.slane %v1319_v18, 4 }
  0xf5   : > { %v1163_v60 = vmax.f32 %v1159_v1, 0.0 }
  0xf6   : > { %v1137_v2 = vpop.f32.mrf.mxu0  ;;  %v1322_v49 = vor.u32 %v1321_v32, %v1317_v29  ;;  %v1399_v43 = vor.u32 %v1398_v46, %v1397_v41 }
  0xf7   : > { %v1167_v5 = vsel %vm2995_vm2, %v1163_v60, 0.0  ;;  %v1144_v6 = vadd.f32 %v1137_v2, %v1074_v59  ;;  %1776 = vmatpush.bf16.msra.mxu1 %v2710_v0 }
  0xf8   : > { %v3249_v11 = vpack.c.bf16 %v1167_v5, %v1166_v51 }
  0xf9   : > { %v1152_v8 = vmul.f32 %v3189_v13, %v1144_v6 }
  0xfa   : > { %v1241_v3 = vshrl.u32 %v3249_v11, 16  ;;  %v1244_v17 = vshll.u32 %v3249_v11, 16 }
  0xfb   : > { %v1160_v19 = vadd.f32 %v3194_v24, %v1152_v8  ;;  %1777 = vmatpush.bf16.msra.mxu1 %v2709_v28 }
  0xfc   : > { %v1243_v20 = vrot.slane %v1241_v3, 3  ;;  %v1246_v21 = vrot.slane %v1244_v17, 4  ;;  %v1534_v16 = vrot.slane %v1244_v17, 1 }
  0xfd   : > { %v1164_v25 = vmax.f32 %v1160_v19, 0.0 }
  0xfe   : > { %v1139_v26 = vpop.f32.mrf.mxu0  ;;  %v3272_v27 = vor.u32 %v1246_v21, %v1243_v20  ;;  %v1535_v18 = vor.u32 %v1534_v16, %v1241_v3  ;;  %v1845_v16 = vld [vmem:[%s3594_s7 + $0x88] sm:$0xff] }
  0xff   : > { %v1168_v31 = vsel %vm2999_vm3, %v1164_v25, 0.0  ;;  %v1145_v36 = vadd.f32 %v1139_v26, %v1075_v23  ;;  %1778 = vmatpush.bf16.msra.mxu1 %v2708_v35 }
 0x100   : > { %v1171_v38 = vpack.c.bf16 %v1168_v31, %v1168_v31  ;;  %v1248_v39 = vsel %vm581_vm6, %v3042_v14, %v3272_v27  ;;  %v1181_v40 = vpack.c.bf16 %v1168_v31, %v1167_v5 }
 0x101   : > { %v1153_v44 = vmul.f32 %v3189_v13, %v1145_v36  ;;  %2446 = vmatmul.msk.bf16.vlgmr.msra.gmra.mxu2 %vm555_vm4, %v1248_v39 }
 0x102   : > { %2429 = vmatmul.msk.bf16.gmra.mxu1 %vm555_vm4, %v1181_v40  ;;  %v1323_v33 = vshll.u32 %v1181_v40, 16  ;;  %v1327_v30 = vshrl.u32 %v1181_v40, 16  ;;  %v1250_v13 = vshrl.u32 %v1171_v38, 16  ;;  %v1253_v55 = vshll.u32 %v1171_v38, 16 }
 0x103   : > { %v1161_v47 = vadd.f32 %v3194_v24, %v1153_v44 }
 0x104   : > { %v1325_v50 = vrot.slane %v1323_v33, 1  ;;  %v1400_v51 = vrot.slane %v1327_v30, 3  ;;  %v1401_v34 = vrot.slane %v1323_v33, 4  ;;  %v1252_v1 = vrot.slane %v1250_v13, 3 }
 0x105   : > { %v1165_v56 = vmax.f32 %v1161_v47, 0.0  ;;  %v1255_v10 = vrot.slane %v1253_v55, 4 }
 0x106   : > { %v1326_v37 = vsel %vm667_vm7, %v1322_v49, %v1325_v50  ;;  %v1402_v22 = vor.u32 %v1401_v34, %v1400_v51  ;;  %v1329_v9 = vor.u32 %v1327_v30, %v1325_v50 }
 0x107   : > { %v1169_v48 = vsel %vm3013_vm5, %v1165_v56, 0.0  ;;  %2472 = vmatmul.msk.bf16.vlgmr.msra.gmra.mxu3 %vm555_vm4, %v1326_v37  ;;  %v1256_v59 = vor.u32 %v1255_v10, %v1252_v1  ;;  %v1884_v37 = vld [vmem:[%s3594_s7 + $0x1c0] sm:$0xff] }
 0x108   : > { %v1307_v57 = vpack.c.bf16 %v1169_v48, %v1169_v48  ;;  %v1403_v24 = vsel %vm581_vm6, %v1399_v43, %v1402_v22  ;;  %v1463_v45 = vpack.c.bf16 %v1169_v48, %v1168_v31  ;;  %v1664_v25 = vpack.c.bf16 0.0, %v1169_v48  ;;  %v1885_v43 = vld [vmem:[%s3594_s7 + $0x1c8] sm:$0xff]  ;;  %1921 = vmatpush.msra.mxu2 %v1884_v37  ;;  %v1864_v37 = vld [vmem:[%s3594_s7 + $0x120] sm:$0xff] }
 0x109   : > { %2498 = vmatmul.msk.bf16.vlgmr.msrb.gmra.mxu0 %vm555_vm4, %v1403_v24  ;;  %v1257_v2 = vsel %vm581_vm6, %v3272_v27, %v1256_v59  ;;  %1941 = vmatpush.msra.mxu3 %v1885_v43  ;;  %v1877_v24 = vld [vmem:[%s3594_s7 + $0x188] sm:$0xff] }
 0x10a   : > { %v1331_v60 = vshll.u32 %v1307_v57, 16  ;;  %v1404_v61 = vshrl.u32 %v1307_v57, 16  ;;  %v1536_v7 = vshll.u32 %v1463_v45, 16  ;;  %v1540_v15 = vshrl.u32 %v1463_v45, 16  ;;  %v1876_v57 = vld [vmem:[%s3594_s7 + $0x180] sm:$0xff]  ;;  %v1865_v43 = vld [vmem:[%s3594_s7 + $0x128] sm:$0xff] }
 0x10b   : > { %v1733_v17 = vshll.u32 %v1664_v25, 16  ;;  %1922 = vmatpush.msra.mxu2 %v1876_v57  ;;  %1942 = vmatpush.msra.mxu3 %v1877_v24  ;;  %v1856_v57 = vld [vmem:[%s3594_s7 + $0xe0] sm:$0xff]  ;;  %v1857_v24 = vld [vmem:[%s3594_s7 + $0xe8] sm:$0xff] }
 0x10c   : > { %v1406_v4 = vrot.slane %v1404_v61, 3  ;;  %v1407_v5 = vrot.slane %v1331_v60, 4  ;;  %v1333_v6 = vrot.slane %v1331_v60, 1  ;;  %v1538_v58 = vrot.slane %v1536_v7, 1  ;;  %v1868_v60 = vld [vmem:[%s3594_s7 + $0x140] sm:$0xff]  ;;  %v1869_v61 = vld [vmem:[%s3594_s7 + $0x148] sm:$0xff] }
 0x10d   : > { %v1606_v19 = vrot.slane %v1540_v15, 3  ;;  %v1607_v20 = vrot.slane %v1536_v7, 4  ;;  %v1735_v3 = vrot.slane %v1733_v17, 1  ;;  %1923 = vmatpush.msra.mxu2 %v1868_v60  ;;  %1943 = vmatpush.msra.mxu3 %v1869_v61  ;;  %v1828_v17 = vld [vmem:[%s3594_s7] sm:$0xff]  ;;  %v1854_v60 = vld [vmem:[%s3594_s7 + $0xd0] sm:$0xff]  ;;  %v1855_v61 = vld [vmem:[%s3594_s7 + $0xd8] sm:$0xff] }
 0x10e   : > { %v1408_v62 = vor.u32 %v1407_v5, %v1406_v4  ;;  %v1334_v8 = vsel %vm667_vm7, %v1329_v9, %v1333_v6  ;;  %v1539_v21 = vsel %vm667_vm7, %v1535_v18, %v1538_v58  ;;  %v1860_v4 = vld [vmem:[%s3594_s7 + $0x100] sm:$0xff]  ;;  %v1861_v5 = vld [vmem:[%s3594_s7 + $0x108] sm:$0xff] }
 0x10f   : > { %v1608_v23 = vor.u32 %v1607_v20, %v1606_v19  ;;  %v1736_v31 = vsel %vm667_vm7, %v1329_v9, %v1735_v3  ;;  %1924 = vmatpush.msra.mxu2 %v1860_v4  ;;  %1944 = vmatpush.msra.mxu3 %v1861_v5  ;;  %v1852_v9 = vld [vmem:[%s3594_s7 + $0xc0] sm:$0xff] }
 0x110   : > { %v1409_v0 = vsel %vm581_vm6, %v1402_v22, %v1408_v62  ;;  %v1853_v62 = vld [vmem:[%s3594_s7 + $0xc8] sm:$0xff]  ;;  %v1836_v20 = vld [vmem:[%s3594_s7 + $0x40] sm:$0xff] }
 0x111   : > { %2447 = vmatmul.msk.bf16.gmra.mxu2 %vm555_vm4, %v1257_v2  ;;  %v1609_v26 = vsel %vm581_vm6, %v3272_v27, %v1608_v23  ;;  %v1610_v36 = vsel %vm581_vm6, %v1608_v23, %v3042_v14  ;;  %v1737_v27 = vshrl.u32 %v1664_v25, 16  ;;  %1945 = vmatpush.msra.mxu3 %v1853_v62  ;;  %v1848_v5 = vld [vmem:[%s3594_s7 + $0xa0] sm:$0xff]  ;;  %v1847_v62 = vld [vmem:[%s3594_s7 + $0x98] sm:$0xff] }
 0x112   : > { %2524 = vmatmul.msk.bf16.vlgmr.msrb.gmra.mxu1 %vm555_vm4, %v3249_v11  ;;  %v1542_v11 = vor.u32 %v1540_v15, %v1538_v58  ;;  %1925 = vmatpush.msra.mxu2 %v1852_v9  ;;  %v1844_v15 = vld [vmem:[%s3594_s7 + $0x80] sm:$0xff] }
 0x113   : > { %v1739_v32 = vor.u32 %v1737_v27, %v1735_v3  ;;  %1946 = vmatpush.msra.mxu3 %v1845_v16  ;;  %v1888_v3 = vld [vmem:[%s3594_s7 + $0x1e0] sm:$0xff]  ;;  %v1886_v27 = vld [vmem:[%s3594_s7 + $0x1d0] sm:$0xff] }
 0x114   : > { %v1543_v29 = vsel %vm667_vm7, %v1542_v11, %v3103_v12  ;;  %1926 = vmatpush.msra.mxu2 %v1844_v15  ;;  %v1829_v11 = vld [vmem:[%s3594_s7 + $0x8] sm:$0xff]  ;;  %2001 = vmatpush.msrb.mxu0 %v1888_v3  ;;  %v2769_v9 = vld [vmem:[%s3592_s5] ss:$0 sm:$0xff] }
 0x115   : > { %v1740_v38 = vsel %vm667_vm7, %v1739_v32, %v3103_v12  ;;  %v1887_v32 = vld [vmem:[%s3594_s7 + $0x1d8] sm:$0xff] }
 0x116   : > { %1927 = vmatpush.msra.mxu2 %v1836_v20 }
 0x117   : > { %2473 = vmatmul.msk.bf16.gmra.mxu3 %vm555_vm4, %v1334_v8 }
 0x118   : > { %1928 = vmatpush.msra.mxu2 %v1828_v17 }
 0x119   : > { %2499 = vmatmul.msk.bf16.gmra.mxu0 %vm555_vm4, %v1409_v0 }
 0x121   : > { %2550 = vmatmul.msk.bf16.vlgmr.msrb.gmra.mxu2 %vm555_vm4, %v1539_v21  ;;  %v1837_v21 = vld [vmem:[%s3594_s7 + $0x48] sm:$0xff] }
 0x122   : > { %2525 = vmatmul.msk.bf16.gmra.mxu1 %vm555_vm4, %v1463_v45  ;;  %1947 = vmatpush.msra.mxu3 %v1837_v21 }
 0x123   : > { %1961 = vmatpush.msrb.mxu2 %v1886_v27 }
 0x124   : > { %1948 = vmatpush.msra.mxu3 %v1829_v11  ;;  %v1830_v11 = vld [vmem:[%s3594_s7 + $0x10] sm:$0xff] }
 0x127   : > { %2576 = vmatmul.msk.bf16.vlgmr.msrb.gmra.mxu3 %vm555_vm4, %v1609_v26 }
 0x128   : > { %1981 = vmatpush.msrb.mxu3 %v1887_v32 }
 0x129   : > { %2602 = vmatmul.msk.bf16.vlgmr.msra.gmra.mxu0 %vm555_vm4, %v1181_v40 }
 0x131   : > { %2551 = vmatmul.msk.bf16.gmra.mxu2 %vm555_vm4, %v1543_v29 }
 0x132   : > { %2628 = vmatmul.msk.bf16.vlgmr.msra.gmra.mxu1 %vm555_vm4, %v1736_v31 }
 0x137   : > { %2577 = vmatmul.msk.bf16.gmra.mxu3 %vm555_vm4, %v1610_v36  ;;  %v1889_v36 = vld [vmem:[%s3594_s7 + $0x1e8] sm:$0xff] }
 0x138   : > { %2021 = vmatpush.msrb.mxu1 %v1889_v36 }
 0x139   : > { %2603 = vmatmul.msk.bf16.gmra.mxu0 %vm555_vm4, %v1664_v25 }
 0x142   : > { %2629 = vmatmul.msk.bf16.gmra.mxu1 %vm555_vm4, %v1740_v38 }
 0x16f   : > { %v1230_v39 = vpop.f32.mrf.mxu1 }
 0x177   : > { %v1232_v40 = vpop.f32.mrf.mxu1 }
 0x17f   : > { %v1235_v44 = vpop.f32.mrf.mxu1 }
 0x184   : > { %v1297_v33 = vpop.f32.mrf.mxu2 }
 0x185   : > { %v1298_v1 = vadd.f32 %v1297_v33, %v1230_v39 }
 0x186   : > { %v1449_v30 = vpop.f32.mrf.mxu0 }
 0x187   : > { %v3331_v41 = vpop.f32.mrf.mxu1 }
 0x18a   : > { %v1374_v46 = vpop.f32.mrf.mxu3 }
 0x18b   : > { %v1384_v2 = vadd.f32 %v1374_v46, %v1298_v1  ;;  %v1878_v46 = vld [vmem:[%s3594_s7 + $0x190] sm:$0xff] }
 0x18c   : > { %v1299_v14 = vpop.f32.mrf.mxu2  ;;  %1962 = vmatpush.msrb.mxu2 %v1878_v46 }
 0x18d   : > { %v1300_v48 = vadd.f32 %v1299_v14, %v1232_v40  ;;  %v1459_v8 = vadd.f32 %v1449_v30, %v1384_v2  ;;  %v1880_v40 = vld [vmem:[%s3594_s7 + $0x1a0] sm:$0xff]  ;;  %v1879_v14 = vld [vmem:[%s3594_s7 + $0x198] sm:$0xff] }
 0x18e   : > { %v1451_v28 = vpop.f32.mrf.mxu0  ;;  %2002 = vmatpush.msrb.mxu0 %v1880_v40  ;;  %1982 = vmatpush.msrb.mxu3 %v1879_v14 }
 0x18f   : > { %v1511_v42 = vpop.f32.mrf.mxu1 }
 0x190   : > { %v1521_v23 = vadd.f32 %v1511_v42, %v1459_v8  ;;  %v1872_v42 = vld [vmem:[%s3594_s7 + $0x160] sm:$0xff] }
 0x191   : > { %2003 = vmatpush.msrb.mxu0 %v1872_v42 }
 0x192   : > { %v1376_v47 = vpop.f32.mrf.mxu3 }
 0x193   : > { %v1385_v35 = vadd.f32 %v1376_v47, %v1300_v48  ;;  %v1873_v47 = vld [vmem:[%s3594_s7 + $0x168] sm:$0xff]  ;;  %2004 = vmatpush.msrb.mxu0 %v1864_v37 }
 0x194   : > { %v1302_v49 = vpop.f32.mrf.mxu2 }
 0x195   : > { %v1460_v45 = vadd.f32 %v1451_v28, %v1385_v35  ;;  %v1303_v7 = vadd.f32 %v1302_v49, %v1235_v44  ;;  %v1881_v44 = vld [vmem:[%s3594_s7 + $0x1a8] sm:$0xff]  ;;  %2005 = vmatpush.msrb.mxu0 %v1856_v57  ;;  %v1891_v57 = vld [vmem:[%s3594_s7 + $0x1f8] sm:$0xff] }
 0x196   : > { %v3333_v13 = vpop.f32.mrf.mxu0  ;;  %2022 = vmatpush.msrb.mxu1 %v1881_v44 }
 0x197   : > { %v1513_v50 = vpop.f32.mrf.mxu1  ;;  %2006 = vmatpush.msrb.mxu0 %v1848_v5  ;;  %v1851_v5 = vld [vmem:[%s3594_s7 + $0xb8] sm:$0xff] }
 0x198   : > { %v1522_v58 = vadd.f32 %v1513_v50, %v1460_v45  ;;  %2023 = vmatpush.msrb.mxu1 %v1873_v47 }
 0x19a   : > { %v1379_v51 = vpop.f32.mrf.mxu3  ;;  %2024 = vmatpush.msrb.mxu1 %v1865_v43 }
 0x19b   : > { %v1386_v18 = vadd.f32 %v1379_v51, %v1303_v7  ;;  %v1841_v7 = vld [vmem:[%s3594_s7 + $0x68] sm:$0xff] }
 0x19c   : > { %v3335_v12 = vpop.f32.mrf.mxu2  ;;  %2025 = vmatpush.msrb.mxu1 %v1857_v24  ;;  %v1883_v24 = vld [vmem:[%s3594_s7 + $0x1b8] sm:$0xff] }
 0x19d   : > { %v1461_v38 = vadd.f32 %v3333_v13, %v1386_v18  ;;  %v1305_v28 = vadd.f32 %v3335_v12, %v3331_v41  ;;  %v1870_v13 = vld [vmem:[%s3594_s7 + $0x150] sm:$0xff]  ;;  %v1871_v41 = vld [vmem:[%s3594_s7 + $0x158] sm:$0xff] }
 0x19e   : > { %v3337_v34 = vpop.f32.mrf.mxu0  ;;  %1963 = vmatpush.msrb.mxu2 %v1870_v13  ;;  %1983 = vmatpush.msrb.mxu3 %v1871_v41  ;;  %v1839_v18 = vld [vmem:[%s3594_s7 + $0x58] sm:$0xff] }
 0x19f   : > { %v3339_v55 = vpop.f32.mrf.mxu1 }
 0x1a0   : > { %v1523_v50 = vadd.f32 %v3339_v55, %v1461_v38  ;;  %v1862_v55 = vld [vmem:[%s3594_s7 + $0x110] sm:$0xff] }
 0x1a1   : > { %1964 = vmatpush.msrb.mxu2 %v1862_v55 }
 0x1a2   : > { %v3341_v56 = vpop.f32.mrf.mxu3 }
 0x1a3   : > { %v1387_v51 = vadd.f32 %v3341_v56, %v1305_v28  ;;  %v1863_v56 = vld [vmem:[%s3594_s7 + $0x118] sm:$0xff]  ;;  %1965 = vmatpush.msrb.mxu2 %v1854_v60 }
 0x1a4   : > { %v1583_v22 = vpop.f32.mrf.mxu2  ;;  %1984 = vmatpush.msrb.mxu3 %v1863_v56  ;;  %v1867_v60 = vld [vmem:[%s3594_s7 + $0x138] sm:$0xff] }
 0x1a5   : > { %v1593_v29 = vadd.f32 %v1583_v22, %v1521_v23  ;;  %v1462_v2 = vadd.f32 %v3337_v34, %v1387_v51  ;;  %v1846_v34 = vld [vmem:[%s3594_s7 + $0x90] sm:$0xff]  ;;  %v1833_v23 = vld [vmem:[%s3594_s7 + $0x28] sm:$0xff] }
 0x1a6   : > { %v3355_v10 = vpop.f32.mrf.mxu0  ;;  %1985 = vmatpush.msrb.mxu3 %v1855_v61  ;;  %1966 = vmatpush.msrb.mxu2 %v1846_v34  ;;  %v1858_v61 = vld [vmem:[%s3594_s7 + $0xf0] sm:$0xff]  ;;  %v1835_v34 = vld [vmem:[%s3594_s7 + $0x38] sm:$0xff] }
 0x1a7   : > { %v3357_v59 = vpop.f32.mrf.mxu1 }
 0x1a8   : > { %1986 = vmatpush.msrb.mxu3 %v1847_v62  ;;  %v1524_v20 = vadd.f32 %v3357_v59, %v1462_v2  ;;  %v1831_v59 = vld [vmem:[%s3594_s7 + $0x18] sm:$0xff] }
 0x1a9   : > { %v1859_v2 = vld [vmem:[%s3594_s7 + $0xf8] sm:$0xff] }
 0x1aa   : > { %v1650_v6 = vpop.f32.mrf.mxu3  ;;  %1987 = vmatpush.msrb.mxu3 %v1839_v18 }
 0x1ab   : > { %v1660_v33 = vadd.f32 %v1650_v6, %v1593_v29  ;;  %v1849_v6 = vld [vmem:[%s3594_s7 + $0xa8] sm:$0xff] }
 0x1ac   : > { %v1585_v0 = vpop.f32.mrf.mxu2  ;;  %2026 = vmatpush.msrb.mxu1 %v1849_v6  ;;  %1988 = vmatpush.msrb.mxu3 %v1831_v59  ;;  %v1842_v6 = vld [vmem:[%s3594_s7 + $0x70] sm:$0xff] }
 0x1ad   : > { %v1594_v26 = vadd.f32 %v1585_v0, %v1522_v58  ;;  %v1720_v22 = vadd.f32 %v3355_v10, %v1660_v33  ;;  %v1840_v0 = vld [vmem:[%s3594_s7 + $0x60] sm:$0xff]  ;;  %v1838_v58 = vld [vmem:[%s3594_s7 + $0x50] sm:$0xff] }
 0x1ae   : > { %v1712_v25 = vpop.f32.mrf.mxu0  ;;  %2007 = vmatpush.msrb.mxu0 %v1840_v0  ;;  %2027 = vmatpush.msrb.mxu1 %v1841_v7  ;;  %v1892_v0 = vld [vmem:[%s3595_s8] sm:$0xff] }
 0x1af   : > { %v3383_v19 = vpop.f32.mrf.mxu1  ;;  %1967 = vmatpush.msrb.mxu2 %v1838_v58  ;;  %v1896_v7 = vperm.slane %v1892_v0, 2 }
 0x1b0   : > { %v1790_v45 = vadd.f32 %v3383_v19, %v1720_v22  ;;  %v1832_v19 = vld [vmem:[%s3594_s7 + $0x20] sm:$0xff]  ;;  %2028 = vmatpush.msrb.mxu1 %v1833_v23 }
 0x1b1   : > { %2008 = vmatpush.msrb.mxu0 %v1832_v19  ;;  %1968 = vmatpush.msrb.mxu2 %v1830_v11 }
 0x1b2   : > { %v1652_v31 = vpop.f32.mrf.mxu3 }
 0x1b3   : > { %v1661_v39 = vadd.f32 %v1652_v31, %v1594_v26  ;;  %v2770_v26 = vld [vmem:[%s3593_s6] ss:$0 sm:$0xff] }
 0x1b4   : > { %v1588_v30 = vpop.f32.mrf.mxu2 }
 0x1b5   : > { %v1721_v49 = vadd.f32 %v1712_v25, %v1661_v39  ;;  %v1595_v48 = vadd.f32 %v1588_v30, %v1523_v50  ;;  %v1798_v25 = vmul.f32 %v2769_v9, %v1790_v45  ;;  %v1843_v45 = vld [vmem:[%s3594_s7 + $0x78] sm:$0xff] }
 0x1b6   : > { %v1715_v1 = vpop.f32.mrf.mxu0 }
 0x1b7   : > { %v1782_v12 = vpop.f32.mrf.mxu1  ;;  %v1806_v32 = vadd.f32 %v2770_v26, %v1798_v25 }
 0x1b8   : > { %v1791_v10 = vadd.f32 %v1782_v12, %v1721_v49 }
 0x1b9   : > { %v1810_v30 = vsel %vm2991_vm1, %v1806_v32, 0.0 }
 0x1ba   : > { %v1655_v35 = vpop.f32.mrf.mxu3  ;;  %v1799_v15 = vmul.f32 %v2769_v9, %v1791_v10  ;;  %v1814_v47 = vsel %vm555_vm4, %v1810_v30, 0.0  ;;  %v1875_v10 = vld [vmem:[%s3594_s7 + $0x178] sm:$0xff] }
 0x1bb   : > { %v1662_v4 = vadd.f32 %v1655_v35, %v1595_v48  ;;  %v1890_v48 = vld [vmem:[%s3594_s7 + $0x1f0] sm:$0xff] }
 0x1bc   : > { %v1590_v16 = vpop.f32.mrf.mxu2  ;;  %v1807_v29 = vadd.f32 %v2770_v26, %v1799_v15  ;;  %v1866_v35 = vld [vmem:[%s3594_s7 + $0x130] sm:$0xff]  ;;  %v1897_v15 = vperm.slane %v1892_v0, 3 }
 0x1bd   : > { %v1722_v8 = vadd.f32 %v1715_v1, %v1662_v4  ;;  %v1596_v3 = vadd.f32 %v1590_v16, %v1524_v20  ;;  %v1874_v1 = vld [vmem:[%s3594_s7 + $0x170] sm:$0xff]  ;;  %v1898_v16 = vperm.slane %v1892_v0, 4  ;;  %v1899_v20 = vperm.slane %v1892_v0, 5 }
 0x1be   : > { %v1717_v38 = vpop.f32.mrf.mxu0  ;;  %v1811_v44 = vsel %vm2995_vm2, %v1807_v29, 0.0  ;;  %v1850_v4 = vld [vmem:[%s3594_s7 + $0xb0] sm:$0xff]  ;;  %v1901_v29 = vperm.slane %v1892_v0, 7 }
 0x1bf   : > { %v1785_v21 = vpop.f32.mrf.mxu1  ;;  %v1815_v28 = vsel %vm555_vm4, %v1811_v44, 0.0 }
 0x1c0   : > { %v1792_v17 = vadd.f32 %v1785_v21, %v1722_v8  ;;  %v1816_v13 = vadd.f32 %v1815_v28, %v1814_v47  ;;  %v1895_v21 = vperm.slane %v1892_v0, 1 }
 0x1c2   : > { %v1800_v31 = vmul.f32 %v2769_v9, %v1792_v17  ;;  %v1657_v36 = vpop.f32.mrf.mxu3 }
 0x1c3   : > { %v1663_v27 = vadd.f32 %v1657_v36, %v1596_v3  ;;  %v1900_v3 = vperm.slane %v1892_v0, 6 }
 0x1c4   : > { %v1808_v39 = vadd.f32 %v2770_v26, %v1800_v31  ;;  %v1894_v31 = vperm.slane %v1892_v0, 0 }
 0x1c5   : > { %v1723_v40 = vadd.f32 %v1717_v38, %v1663_v27 }
 0x1c6   : > { %v1812_v46 = vsel %vm2999_vm3, %v1808_v39, 0.0 }
 0x1c7   : > { %v1787_v33 = vpop.f32.mrf.mxu1  ;;  %v1817_v49 = vsel %vm555_vm4, %v1812_v46, 0.0 }
 0x1c8   : > { %v1793_v14 = vadd.f32 %v1787_v33, %v1723_v40  ;;  %v1818_v50 = vadd.f32 %v1817_v49, %v1816_v13 }
 0x1ca   : > { %v1801_v42 = vmul.f32 %v2769_v9, %v1793_v14  ;;  %v1834_v9 = vld [vmem:[%s3594_s7 + $0x30] sm:$0xff] }
 0x1cc   : > { %v1809_v41 = vadd.f32 %v2770_v26, %v1801_v42 }
 0x1ce   : > { %v1813_v53 = vsel %vm3013_vm5, %v1809_v41, 0.0 }
 0x1cf   : > { %v1819_v52 = vsel %vm555_vm4, %v1813_v53, 0.0 }
 0x1d0   : > { %v1820_v51 = vadd.f32 %v1819_v52, %v1818_v50 }
 0x1d2   : > { %v1821_v12 = vrot.slane %v1820_v51, 4 }
 0x1d4   : > { %v1822_v54 = vadd.f32 %v1821_v12, %v1820_v51 }
 0x1d6   : > { %v1823_v37 = vrot.slane %v1822_v54, 2 }
 0x1d8   : > { %v1824_v43 = vadd.f32 %v1823_v37, %v1822_v54 }
 0x1da   : > { %v1825_v22 = vrot.slane %v1824_v43, 1 }
 0x1dc   : > { %v1826_v55 = vadd.f32 %v1825_v22, %v1824_v43 }
 0x1de   : > { %v1827_v56 = vmul.f32 0.0625, %v1826_v55 }
 0x1e0   : > { %2630 = vmatmul.msk.f32.vlgmr.msra.gmra.mxu2 %vm555_vm4, %v1827_v56  ;;  %2631 = vmatmul.msk.f32.vlgmr.msra.gmra.mxu3 %vm555_vm4, %v1827_v56 }
 0x1e1   : > { %2634 = vmatmul.msk.f32.vlgmr.msrb.gmra.mxu0 %vm555_vm4, %v1827_v56  ;;  %2635 = vmatmul.msk.f32.vlgmr.msrb.gmra.mxu1 %vm555_vm4, %v1827_v56 }
 0x1e2   : > { %2041 = vmatpush.msra.mxu2 %v1890_v48  ;;  %2061 = vmatpush.msra.mxu3 %v1891_v57 }
 0x1e4   : > { %2042 = vmatpush.msra.mxu2 %v1882_v63  ;;  %2062 = vmatpush.msra.mxu3 %v1883_v24 }
 0x1e6   : > { %2043 = vmatpush.msra.mxu2 %v1874_v1  ;;  %2063 = vmatpush.msra.mxu3 %v1875_v10 }
 0x1e8   : > { %2044 = vmatpush.msra.mxu2 %v1866_v35  ;;  %2064 = vmatpush.msra.mxu3 %v1867_v60 }
 0x1e9   : > { %2632 = vmatmul.msk.f32.vlgmr.msrb.gmra.mxu2 %vm555_vm4, %v1827_v56  ;;  %2633 = vmatmul.msk.f32.vlgmr.msrb.gmra.mxu3 %vm555_vm4, %v1827_v56 }
 0x1ea   : > { %2045 = vmatpush.msra.mxu2 %v1858_v61  ;;  %2065 = vmatpush.msra.mxu3 %v1859_v2 }
 0x1ec   : > { %2046 = vmatpush.msra.mxu2 %v1850_v4  ;;  %2066 = vmatpush.msra.mxu3 %v1851_v5 }
 0x1ee   : > { %2047 = vmatpush.msra.mxu2 %v1842_v6  ;;  %2067 = vmatpush.msra.mxu3 %v1843_v45 }
 0x1f0   : > { %2048 = vmatpush.msra.mxu2 %v1834_v9  ;;  %2068 = vmatpush.msra.mxu3 %v1835_v34 }
 0x1f1   : > { %2636 = vmatmul.msk.f32.vlgmr.msra.gmra.mxu2 %vm555_vm4, %v1827_v56  ;;  %2637 = vmatmul.msk.f32.vlgmr.msra.gmra.mxu3 %vm555_vm4, %v1827_v56 }
 0x25e   : > { %v2010_v19 = vpop.f32.mrf.mxu0  ;;  %v2030_v23 = vpop.f32.mrf.mxu1 }
 0x25f   : > { %v2011_v17 = vadd.f32 %v2010_v19, %v1898_v16  ;;  %v2031_v11 = vadd.f32 %v2030_v23, %v1899_v20 }
 0x261   : > { %v2084_v32 = vrot.slane %v2011_v17, 4  ;;  %v2085_v40 = vrot.slane %v2031_v11, 3 }
 0x263   : > { %v1930_v62 = vpop.f32.mrf.mxu2  ;;  %v1950_v8 = vpop.f32.mrf.mxu3  ;;  %v2095_v47 = vsel %vm2094_vm8, %v2084_v32, %v2085_v40 }
 0x264   : > { %v1951_v59 = vadd.f32 %v1950_v8, %v1895_v21  ;;  %v1931_v46 = vadd.f32 %v1930_v62, %v1894_v31 }
 0x266   : > { %v2081_v44 = vrot.slane %v1951_v59, 7 }
 0x268   : > { %v2089_v49 = vsel %vm2088_vm10, %v1931_v46, %v2081_v44 }
 0x26c   : > { %v1970_v58 = vpop.f32.mrf.mxu2  ;;  %v1990_v18 = vpop.f32.mrf.mxu3 }
 0x26d   : > { %v1971_v25 = vadd.f32 %v1970_v58, %v1896_v7  ;;  %v1991_v26 = vadd.f32 %v1990_v18, %v1897_v15 }
 0x26f   : > { %v2082_v36 = vrot.slane %v1971_v25, 6  ;;  %v2083_v27 = vrot.slane %v1991_v26, 5 }
 0x271   : > { %v2091_v14 = vsel %vm2090_vm9, %v2082_v36, %v2083_v27 }
 0x272   : > { %v2093_v41 = vsel %vm2092_vm11, %v2089_v49, %v2091_v14 }
 0x274   : > { %v2050_v38 = vpop.f32.mrf.mxu2  ;;  %v2070_v39 = vpop.f32.mrf.mxu3 }
 0x275   : > { %v2051_v33 = vadd.f32 %v2050_v38, %v1900_v3  ;;  %v2071_v30 = vadd.f32 %v2070_v39, %v1901_v29 }
 0x277   : > { %v2086_v28 = vrot.slane %v2051_v33, 2  ;;  %v2087_v42 = vrot.slane %v2071_v30, 1 }
 0x279   : > { %v2097_v13 = vsel %vm2096_vm12, %v2086_v28, %v2087_v42 }
 0x27a   : > { %v2099_v50 = vsel %vm2098_vm13, %v2095_v47, %v2097_v13 }
 0x27b   : > { %v2101_v53 = vsel %vm2100_vm14, %v2093_v41, %v2099_v50 }
 0x27c   : > { %2103 = vst [vmem:[%s330_s16] sm:$0xff] %v2101_v53 }
 0x27d PF: > { %s19_s30 = sadd.s32 1, %s2777_s30  }
 0x27e   : > { %p16_p4 = scmp.ge.s32.totalorder %s19_s30, 4  }
 0x280   :  { %18 = sbr.rel (!%p16_p4) target bundleno = 1 (0x1), region = 105 }

</bundles_post_ra>
